<compile_context>
chip_gen: v6e
topology: v6e:2x2x1
jax: 0.10.0
libtpu: 0.0.40
codegen_flags: <defaults>
</compile_context>

<pallas_src>
import functools

import jax
import jax.numpy as jnp
from jax.experimental import pallas as pl
from jax.experimental.pallas import tpu as pltpu


# MXU-native dtype on v5e/v6e/v7x; accumulation stays f32 via preferred_element_type.
MATMUL_DTYPE = jnp.bfloat16
# <= physical VMEM on every generation (v7x physical = 64 MiB); gives headroom over the
# 16/32 MiB scoped defaults if tiles grow at realistic graph sizes.
VMEM_LIMIT = 64 * 1024 * 1024


def _round_up(x, m):
    return (x + m - 1) // m * m


# ----------------------------------------------------------------------------- #
# Fused multi-pair matmul kernel:  out = relu?(sum_i a_i @ b_i + bias)           #
# ----------------------------------------------------------------------------- #
def _mm_fused_kernel(*refs, relu, n_pairs):
    out_ref = refs[-1]
    bias_ref = refs[-2]
    acc = jnp.dot(refs[0][...], refs[1][...], preferred_element_type=jnp.float32)
    for p in range(1, n_pairs):
        acc = acc + jnp.dot(refs[2 * p][...], refs[2 * p + 1][...],
                            preferred_element_type=jnp.float32)
    acc = acc + bias_ref[...]          # f32 epilogue (bias broadcast over rows)
    if relu:
        acc = jnp.maximum(acc, 0.0)
    out_ref[...] = acc.astype(out_ref.dtype)


def pallas_fused_matmul(pairs, bias=None, relu=False):
    """out = relu?(sum_i a_i @ b_i + bias).  pairs: [(a_i [M,K_i], b_i [K_i,N]), ...].

    MXU inputs are cast to bf16, accumulation in f32, f32 output."""
    M = pairs[0][0].shape[0]
    N = pairs[0][1].shape[1]
    if bias is None:
        bias = jnp.zeros((N,), jnp.float32)

    # M tiling: split into >=2 'parallel' blocks (keeps both v7x TensorCores busy), capped
    # at 512 rows (big tiles amortize the ~0.35us/grid-step overhead).
    if M <= 8:
        tm, Mp = M, M
    else:
        tm = min(512, _round_up(-(-M // 2), 8))
        Mp = _round_up(M, tm)
    # N tiling: full-extent (lane dense) when small, else 256/512-wide tiles (never 128).
    if N <= 512:
        tn, Np = N, N
    else:
        tn = 512 if N % 512 == 0 else 256
        Np = _round_up(N, tn)

    in_specs, args = [], []
    for (a, b) in pairs:
        K = a.shape[1]
        assert b.shape[0] == K and a.shape[0] == M and b.shape[1] == N
        a = a.astype(MATMUL_DTYPE)
        b = b.astype(MATMUL_DTYPE)
        K8 = _round_up(K, 8)
        if K8 != K:  # zero-pad the contraction dim (exact)
            a = jnp.pad(a, ((0, 0), (0, K8 - K)))
            b = jnp.pad(b, ((0, K8 - K), (0, 0)))
        if Mp != M:
            a = jnp.pad(a, ((0, Mp - M), (0, 0)))
        if Np != N:
            b = jnp.pad(b, ((0, 0), (0, Np - N)))
        in_specs.append(pl.BlockSpec((tm, K8), lambda i, j: (i, 0)))
        in_specs.append(pl.BlockSpec((K8, tn), lambda i, j: (0, j)))
        args.extend([a, b])

    bias_p = bias.astype(jnp.float32).reshape(1, N)
    if Np != N:
        bias_p = jnp.pad(bias_p, ((0, 0), (0, Np - N)))
    in_specs.append(pl.BlockSpec((1, tn), lambda i, j: (0, j)))
    args.append(bias_p)

    # TODO(synk): every contraction dim in this module is <= (T+2)*Hd; add a K grid axis
    # with an f32 VMEM accumulator if K ever grows into the multi-thousands.
    out = pl.pallas_call(
        functools.partial(_mm_fused_kernel, relu=relu, n_pairs=len(pairs)),
        out_shape=jax.ShapeDtypeStruct((Mp, Np), jnp.float32),
        grid_spec=pltpu.PrefetchScalarGridSpec(
            num_scalar_prefetch=0,
            grid=(Mp // tm, Np // tn),
            in_specs=in_specs,
            out_specs=pl.BlockSpec((tm, tn), lambda i, j: (i, j)),
        ),
        compiler_params=pltpu.CompilerParams(
            dimension_semantics=("parallel", "parallel"),
            vmem_limit_bytes=VMEM_LIMIT),
    )(*args)

    if Mp != M or Np != N:
        out = out[:M, :N]
    return out


def pallas_matmul(a, b, bias=None, relu=False):
    return pallas_fused_matmul([(a, b)], bias=bias, relu=relu)


# ----------------------------------------------------------------------------- #
# Fused HypergraphConv layer: grid=(T,), batch packed into lanes                  #
# ----------------------------------------------------------------------------- #
def _hgconv_layer_kernel(a_ref, bt_ref, x_ref, w_ref, bias_ref, node_ref, edge_ref):
    # One timestep per grid step; the whole batch lives in the lane dim (B*Hd), so the two
    # incidence matmuls run at B*Hd lane occupancy and the a/bt/W DMAs are reused across
    # the batch.  All three matmuls chain in VMEM; accumulation stays f32.
    theta = jnp.dot(x_ref[...], w_ref[...], preferred_element_type=jnp.float32)     # [N, B*Hd]
    edge = jnp.dot(a_ref[...], theta.astype(MATMUL_DTYPE),
                   preferred_element_type=jnp.float32)                               # [Ep, B*Hd]
    node = jnp.dot(bt_ref[...], edge.astype(MATMUL_DTYPE),
                   preferred_element_type=jnp.float32) + bias_ref[...]               # [N, B*Hd]
    edge_ref[...] = edge.astype(edge_ref.dtype)
    node_ref[...] = node.astype(node_ref.dtype)


def hypergraph_layer(a_norm, b_norm, x, w, bias):
    """Batched HypergraphConv (symdegnorm, no attention); batch packed into lanes.

    a_norm: [T, Ep, N] = D_e^-1 H D_n^-1/2     b_norm: [T, N, Ep] = D_n^-1/2 H^T
    x: [T, N, B, Cin]   w: [Cin, Hd]   bias: [Hd]
    Returns node_out [T, N, B*Hd], edge_out [T, Ep, B*Hd]  (f32, lane layout b*Hd + h).
    """
    T, Ep, N = a_norm.shape
    _, _, Bsz, Cin = x.shape
    Hd = w.shape[1]

    # pad the per-batch channel chunk to a sublane multiple (zero padding is exact)
    Cin_p = _round_up(Cin, 8)
    if Cin_p != Cin:
        x = jnp.pad(x, ((0, 0), (0, 0), (0, 0), (0, Cin_p - Cin)))
        w = jnp.pad(w, ((0, Cin_p - Cin), (0, 0)))
    x_packed = x.reshape(T, N, Bsz * Cin_p)

    # Block-diagonal theta weight: applies W independently per batch lane-chunk.  The
    # B-fold structural-zero FLOPs in the theta matmul are negligible next to the two
    # incidence matmuls (contraction over N / Ep), which now run at B*Hd lane width.
    eye = jnp.eye(Bsz, dtype=jnp.float32)
    w_bd = (eye[:, None, :, None] * w.astype(jnp.float32)[None, :, None, :]
            ).reshape(Bsz * Cin_p, Bsz * Hd)
    bias_t = jnp.tile(bias.astype(jnp.float32), Bsz).reshape(1, Bsz * Hd)

    BCin, BHd = Bsz * Cin_p, Bsz * Hd
    # TODO(synk): for very large graphs (Ep, N in the thousands) tile the incidence matmuls
    # over Ep/N with a VMEM accumulator so the per-step footprint fits v7x's 64 MiB.
    node_out, edge_out = pl.pallas_call(
        _hgconv_layer_kernel,
        out_shape=(jax.ShapeDtypeStruct((T, N, BHd), jnp.float32),
                   jax.ShapeDtypeStruct((T, Ep, BHd), jnp.float32)),
        grid_spec=pltpu.PrefetchScalarGridSpec(
            num_scalar_prefetch=0,
            grid=(T,),
            in_specs=[
                pl.BlockSpec((None, Ep, N), lambda t: (t, 0, 0)),
                pl.BlockSpec((None, N, Ep), lambda t: (t, 0, 0)),
                pl.BlockSpec((None, N, BCin), lambda t: (t, 0, 0)),
                pl.BlockSpec((BCin, BHd), lambda t: (0, 0)),
                pl.BlockSpec((1, BHd), lambda t: (0, 0)),
            ],
            out_specs=(
                pl.BlockSpec((None, N, BHd), lambda t: (t, 0, 0)),
                pl.BlockSpec((None, Ep, BHd), lambda t: (t, 0, 0)),
            ),
        ),
        compiler_params=pltpu.CompilerParams(
            dimension_semantics=("parallel",),
            vmem_limit_bytes=VMEM_LIMIT),
    )(a_norm.astype(MATMUL_DTYPE), b_norm.astype(MATMUL_DTYPE),
      x_packed.astype(MATMUL_DTYPE), w_bd.astype(MATMUL_DTYPE), bias_t)
    return node_out, edge_out


# ----------------------------------------------------------------------------- #
# Fused 2-layer MLP decoder (Linear -> ReLU -> Linear(out=1)), tiled over rows    #
# ----------------------------------------------------------------------------- #
def _mlp2_kernel(x_ref, w1_ref, b1_ref, w2t_ref, b2_ref, o_ref):
    h = jnp.dot(x_ref[...], w1_ref[...], preferred_element_type=jnp.float32) + b1_ref[...]
    h = jnp.maximum(h, 0.0)
    # out_channels == 1: VPU multiply + lane reduction instead of a 1-column MXU matmul.
    o_ref[...] = jnp.sum(h * w2t_ref[...], axis=-1, keepdims=True) + b2_ref[...]


def pallas_mlp2(x, w1, b1, w2, b2):
    """Fused Linear -> ReLU -> Linear(out=1).   x: [..., Din] -> [..., 1]."""
    shp = x.shape
    Din = shp[-1]
    Dh = w1.shape[1]
    assert w1.shape[0] == Din and w2.shape == (Dh, 1)
    x2 = x.reshape(-1, Din).astype(MATMUL_DTYPE)
    M = x2.shape[0]
    # >=2 'parallel' row blocks (v7x megacore) and <=512 rows per block so the decoder
    # stays double-buffered and VMEM-bounded even when num_pos approaches 10000.
    if M <= 8:
        tm, Mp = M, M
    else:
        tm = min(512, _round_up(-(-M // 2), 8))
        Mp = _round_up(M, tm)
    if Mp != M:
        x2 = jnp.pad(x2, ((0, Mp - M), (0, 0)))
    out = pl.pallas_call(
        _mlp2_kernel,
        out_shape=jax.ShapeDtypeStruct((Mp, 1), jnp.float32),
        grid_spec=pltpu.PrefetchScalarGridSpec(
            num_scalar_prefetch=0,
            grid=(Mp // tm,),
            in_specs=[
                pl.BlockSpec((tm, Din), lambda i: (i, 0)),
                pl.BlockSpec((Din, Dh), lambda i: (0, 0)),
                pl.BlockSpec((1, Dh), lambda i: (0, 0)),
                pl.BlockSpec((1, Dh), lambda i: (0, 0)),
                pl.BlockSpec((1, 1), lambda i: (0, 0)),
            ],
            out_specs=pl.BlockSpec((tm, 1), lambda i: (i, 0)),
        ),
        compiler_params=pltpu.CompilerParams(
            dimension_semantics=("parallel",),
            vmem_limit_bytes=VMEM_LIMIT),
    )(x2, w1.astype(MATMUL_DTYPE), b1.astype(jnp.float32).reshape(1, Dh),
      jnp.transpose(w2).astype(jnp.float32), b2.astype(jnp.float32).reshape(1, 1))
    return out[:M].reshape(shp[:-1] + (1,))


# ----------------------------------------------------------------------------- #
# (1 x K) Conv2d -> single matmul via a banded (Toeplitz) weight                  #
# ----------------------------------------------------------------------------- #
def _banded_conv_weight(w, t_in, t_out, offset=0):
    """For a channels-last slab x: [rows, t_in, Cin] flattened to [rows, t_in*Cin], returns
    Wb [t_in*Cin, t_out*Cout] such that
        out[m, t*Cout + co] = sum_{k, ci} x[m, (t + k + offset)*Cin + ci] * w[co, ci, 0, k],
    with out-of-range input positions dropped (i.e. zero padding folded into the weight).
    Lowers an nn.Conv2d with kernel (1, K) to one matmul with NO activation duplication."""
    Cout, Cin, _, K = w.shape
    wk = jnp.transpose(w[:, :, 0, :], (2, 1, 0))          # [K, Cin, Cout]
    tp = jnp.arange(t_in)[:, None]                        # input position
    to = jnp.arange(t_out)[None, :]                       # output position
    k = tp - to - offset
    valid = (k >= 0) & (k < K)
    blocks = wk[jnp.clip(k, 0, K - 1)]                    # [t_in, t_out, Cin, Cout]
    blocks = jnp.where(valid[:, :, None, None], blocks, 0.0)
    blocks = jnp.transpose(blocks, (0, 2, 1, 3))          # [t_in, Cin, t_out, Cout]
    return blocks.reshape(t_in * Cin, t_out * Cout)


# ----------------------------------------------------------------------------- #
# DTHGNN forward                                                                  #
# ----------------------------------------------------------------------------- #
def dthgnn_forward(params, node_features, H_stack, pos_node_idx, pos_edge_idx, neg_key):
    """node_features: [B, T, N, Cin];  H_stack: [T, E, N] dense incidence per timestep."""
    B, T, N, Cin = node_features.shape
    E = H_stack.shape[1]
    Hd = params["gnn_W"].shape[1]
    Kk = params["node_agg_w"].shape[-1]
    P_out = params["final_conv_w"].shape[0]

    # ---- degree-normalized incidence operators (folded once; hyperedges padded to 8) ----
    Ep = _round_up(E, 8)
    H_pad = jnp.pad(H_stack.astype(jnp.float32), ((0, 0), (0, Ep - E), (0, 0)))
    deg_n = jnp.maximum(H_pad.sum(axis=1), 1.0)                      # [T, N]
    deg_e = jnp.maximum(H_pad.sum(axis=2), 1.0)                      # [T, Ep]
    dn = 1.0 / jnp.sqrt(deg_n)
    de = 1.0 / deg_e
    a_norm = de[:, :, None] * H_pad * dn[:, None, :]                 # [T, Ep, N]
    b_norm = dn[:, :, None] * jnp.transpose(H_pad, (0, 2, 1))        # [T, N, Ep]

    # ---- two HypergraphConv layers: one pallas_call each, grid=(T,), batch in lanes ----
    x_in = jnp.transpose(node_features, (1, 2, 0, 3))                # [T, N, B, Cin]
    node1, edge1 = hypergraph_layer(a_norm, b_norm, x_in,
                                    params["gnn_W"], params["gnn_b"])
    node2, edge2 = hypergraph_layer(a_norm, b_norm, node1.reshape(T, N, B, Hd),
                                    params["gnn2_W"], params["gnn2_b"])
    # torch's ignored `_` return = layer-1 edge embedding at the last timestep
    last_gnn_edge_emb = jnp.transpose(edge1[T - 1, :E, :].reshape(E, B, Hd), (1, 0, 2))

    # channels-last slabs consumed by every conv below (one layout pass per tensor; it also
    # unpacks the B*Hd lane packing)
    x_cl = jnp.transpose(node2.reshape(T, N, B, Hd), (2, 1, 0, 3))           # [B, N, T, Hd]
    edge_cl = jnp.transpose(edge2[:, :E, :].reshape(T, E, B, Hd), (2, 1, 0, 3))  # [B, E, T, Hd]
    nf_cl = jnp.transpose(node_features, (0, 2, 1, 3))                       # [B, N, T, Cin]

    # ---- time_conv (1x3, pad 1) + residual_conv (1x1) + ReLU fused into ONE kernel ----
    # conv zero-padding folded into the banded weight (offset=-1): no HBM pad/concat copy.
    w_time = _banded_conv_weight(params["time_conv_w"], T, T, offset=-1)     # [T*Hd,  T*Hd]
    w_res = _banded_conv_weight(params["res_conv_w"], T, T, offset=0)        # [T*Cin, T*Hd]
    bias_tr = jnp.tile(params["time_conv_b"] + params["res_conv_b"], T)
    x_pred = pallas_fused_matmul(
        [(x_cl.reshape(B * N, T * Hd), w_time),
         (nf_cl.reshape(B * N, T * Cin), w_res)],
        bias_tr, relu=True).reshape(B, N, T, Hd)

    # ---- final_conv: only the last output position is consumed -> one tiny matmul ----
    a_fin = x_pred[:, :, :, Hd - Kk:].reshape(B * N, T * Kk)
    w_fin = jnp.transpose(params["final_conv_w"][:, :, 0, :].reshape(P_out, T * Kk))
    indiv_logit = pallas_matmul(a_fin, w_fin, params["final_conv_b"]).reshape(B, N, P_out)

    # ---- node / edge aggregators: banded-conv matmuls over the time-masked slabs ----
    Tm = T - Kk                                                      # = (T-1) - Kk + 1
    w_na = _banded_conv_weight(params["node_agg_w"], T - 1, Tm, offset=0)
    w_ea = _banded_conv_weight(params["edge_agg_w"], T - 1, Tm, offset=0)
    agg_cl = pallas_matmul(x_cl[:, :, :T - 1, :].reshape(B * N, (T - 1) * Hd),
                           w_na, jnp.tile(params["node_agg_b"], Tm)
                           ).reshape(B, N, Tm, Hd)
    eagg_cl = pallas_matmul(edge_cl[:, :, :T - 1, :].reshape(B * E, (T - 1) * Hd),
                            w_ea, jnp.tile(params["edge_agg_b"], Tm)
                            ).reshape(B, E, Tm, Hd)
    # reproduce torch's raw `[B, Hd, *, Tm].reshape(B, *, -1)` scrambled flatten exactly
    agg = jnp.transpose(agg_cl, (0, 3, 1, 2)).reshape(B, N, Hd * Tm)
    eagg = jnp.transpose(eagg_cl, (0, 3, 1, 2)).reshape(B, E, Hd * Tm)

    # ---- score decoder on positive + sampled negative pairs: ONE fused MLP call ----
    P = pos_node_idx.shape[0]
    num_pos = P * 2 if P * 2 < 10000 else P
    k1, k2 = jax.random.split(neg_key)
    # NOTE: mirrors the reference code, which samples negative indices in [0, batch_size)
    neg_node_idx = jax.random.randint(k1, (num_pos,), 0, agg.shape[0])
    neg_edge_idx = jax.random.randint(k2, (num_pos,), 0, eagg.shape[0])

    pos_scores = agg[:, pos_node_idx, :] * eagg[:, pos_edge_idx, :]
    neg_scores = agg[:, neg_node_idx, :] * eagg[:, neg_edge_idx, :]
    logits = pallas_mlp2(jnp.concatenate([pos_scores, neg_scores], axis=1),
                         params["mlp_W1"], params["mlp_b1"],
                         params["mlp_W2"], params["mlp_b2"])
    pos_recon_logit = logits[:, :P]
    neg_recon_logit = logits[:, P:]

    # training-mode return of the module (the eval-mode recon_graph CPU-offload branch is
    # not exercised here).
    return indiv_logit, last_gnn_edge_emb, pos_recon_logit, neg_recon_logit


# ----------------------------------------------------------------------------- #
# Deterministic parameter init (xavier-uniform for >1-D, uniform(0,1) for 1-D)    #
# ----------------------------------------------------------------------------- #
def _xavier(key, shape, fan_in, fan_out):
    bound = (6.0 / (fan_in + fan_out)) ** 0.5
    return jax.random.uniform(key, shape, jnp.float32, -bound, bound)


def init_params(key, in_channels, hidden, len_input, num_for_predict, kernal_size):
    ks = jax.random.split(key, 20)
    dec_in = hidden * (len_input - kernal_size)
    p = {
        "gnn_W": _xavier(ks[0], (in_channels, hidden), in_channels, hidden),
        "gnn_b": jax.random.uniform(ks[1], (hidden,), jnp.float32, 0.0, 1.0),
        "gnn2_W": _xavier(ks[2], (hidden, hidden), hidden, hidden),
        "gnn2_b": jax.random.uniform(ks[3], (hidden,), jnp.float32, 0.0, 1.0),
        "time_conv_w": _xavier(ks[4], (hidden, hidden, 1, 3), hidden * 3, hidden * 3),
        "time_conv_b": jax.random.uniform(ks[5], (hidden,), jnp.float32, 0.0, 1.0),
        "res_conv_w": _xavier(ks[6], (hidden, in_channels, 1, 1), in_channels, hidden),
        "res_conv_b": jax.random.uniform(ks[7], (hidden,), jnp.float32, 0.0, 1.0),
        "final_conv_w": _xavier(ks[8], (num_for_predict, len_input, 1, kernal_size),
                                len_input * kernal_size, num_for_predict * kernal_size),
        "final_conv_b": jax.random.uniform(ks[9], (num_for_predict,), jnp.float32, 0.0, 1.0),
        "node_agg_w": _xavier(ks[10], (hidden, hidden, 1, kernal_size),
                              hidden * kernal_size, hidden * kernal_size),
        "node_agg_b": jax.random.uniform(ks[11], (hidden,), jnp.float32, 0.0, 1.0),
        "edge_agg_w": _xavier(ks[12], (hidden, hidden, 1, kernal_size),
                              hidden * kernal_size, hidden * kernal_size),
        "edge_agg_b": jax.random.uniform(ks[13], (hidden,), jnp.float32, 0.0, 1.0),
        "mlp_W1": _xavier(ks[14], (dec_in, hidden), dec_in, hidden),
        "mlp_b1": jax.random.uniform(ks[15], (hidden,), jnp.float32, 0.0, 1.0),
        "mlp_W2": _xavier(ks[16], (hidden, 1), hidden, 1),
        "mlp_b2": jax.random.uniform(ks[17], (1,), jnp.float32, 0.0, 1.0),
    }
    return p


# ----------------------------------------------------------------------------- #
# Driver                                                                          #
# ----------------------------------------------------------------------------- #
if __name__ == "__main__":
    # small, module-consistent config
    batch = 2
    timestep = 8          # == len_input, time_strides = 1
    num_node = 16
    num_edge = 6          # num_hyperedge
    in_channels = 4
    hidden = 32
    kernal_size = 3
    num_for_predict = 1
    nnz = 12              # incidence pairs per timestep

    root = jax.random.PRNGKey(0)
    k_feat, k_param, k_edges, k_neg = jax.random.split(root, 4)

    node_features = jax.random.normal(
        k_feat, (batch, timestep, num_node, in_channels), jnp.float32)

    # dynamic hyperedge list: per-timestep (node_idx, edge_idx) pairs + dense incidence
    H_rows, edge_lists = [], []
    ek = jax.random.split(k_edges, timestep)
    for t in range(timestep):
        kn, ke = jax.random.split(ek[t])
        n_idx = jax.random.randint(kn, (nnz,), 0, num_node)
        e_idx = jax.random.randint(ke, (nnz,), 0, num_edge)
        Ht = jnp.zeros((num_edge, num_node), jnp.float32).at[e_idx, n_idx].set(1.0)
        H_rows.append(Ht)
        edge_lists.append((n_idx, e_idx))
    H_stack = jnp.stack(H_rows, axis=0)                    # [T, E, N]

    pos_node_idx, pos_edge_idx = edge_lists[-1]            # dynamic_edge_list[-1]

    params = init_params(k_param, in_channels, hidden, timestep,
                         num_for_predict, kernal_size)

    fwd = jax.jit(dthgnn_forward)
    outs = fwd(params, node_features, H_stack, pos_node_idx, pos_edge_idx, k_neg)
    outs = jax.block_until_ready(outs)

    indiv_logit, last_edge_emb, pos_logit, neg_logit = outs
    assert indiv_logit.shape == (batch, num_node, num_for_predict)
    assert last_edge_emb.shape == (batch, num_edge, hidden)
    assert pos_logit.shape == (batch, nnz, 1)
    assert neg_logit.shape == (batch, 2 * nnz, 1)
    assert all(bool(jnp.all(jnp.isfinite(o)))
               for o in (indiv_logit, last_edge_emb, pos_logit, neg_logit))
    print("KERNEL_OK")
</pallas_src>

<mosaic_0001>
module attributes {stable_mosaic.version = 11 : i64} {
  func.func @_hgconv_layer_kernel(%arg0: i32, %arg1: memref<1x8x16xbf16, #tpu.memory_space<vmem>>, %arg2: memref<1x16x8xbf16, #tpu.memory_space<vmem>>, %arg3: memref<1x16x16xbf16, #tpu.memory_space<vmem>>, %arg4: memref<16x64xbf16, #tpu.memory_space<vmem>>, %arg5: memref<1x64xf32, #tpu.memory_space<vmem>>, %arg6: memref<1x16x64xf32, #tpu.memory_space<vmem>>, %arg7: memref<1x8x64xf32, #tpu.memory_space<vmem>>) attributes {dimension_semantics = [#tpu.dimension_semantics<parallel>], iteration_bounds = array<i64: 8>, scalar_prefetch = 0 : i64, scratch_operands = 0 : i64, tpu.core_type = #tpu.core_type<tc>, window_params = [{transform_indices = @transform_0, window_bounds = array<i64: 1, 8, 16>}, {transform_indices = @transform_1, window_bounds = array<i64: 1, 16, 8>}, {transform_indices = @transform_2, window_bounds = array<i64: 1, 16, 16>}, {pipeline_mode = #tpu.pipeline_mode<synchronous>, transform_indices = @transform_3, window_bounds = array<i64: 16, 64>}, {pipeline_mode = #tpu.pipeline_mode<synchronous>, transform_indices = @transform_4, window_bounds = array<i64: 1, 64>}, {transform_indices = @transform_5, window_bounds = array<i64: 1, 16, 64>}, {transform_indices = @transform_6, window_bounds = array<i64: 1, 8, 64>}]} {
    %c0 = arith.constant 0 : index
    %c0_0 = arith.constant 0 : index
    %c0_1 = arith.constant 0 : index
    %0 = vector.load %arg3[%c0, %c0_0, %c0_1] : memref<1x16x16xbf16, #tpu.memory_space<vmem>>, vector<1x16x16xbf16>
    %1 = vector.shape_cast %0 : vector<1x16x16xbf16> to vector<16x16xbf16>
    %c0_2 = arith.constant 0 : index
    %c0_3 = arith.constant 0 : index
    %2 = vector.load %arg4[%c0_2, %c0_3] : memref<16x64xbf16, #tpu.memory_space<vmem>>, vector<16x64xbf16>
    %cst = arith.constant dense<0.000000e+00> : vector<16x64xf32>
    %3 = tpu.matmul %1, %2, %cst {dimension_numbers = #tpu.dot_dimension_numbers<[1], [0], [0], [1], [0, 0, 1, 1], [], []>} : vector<16x16xbf16>, vector<16x64xbf16>, vector<16x64xf32> -> vector<16x64xf32>
    %c0_4 = arith.constant 0 : index
    %c0_5 = arith.constant 0 : index
    %c0_6 = arith.constant 0 : index
    %4 = vector.load %arg1[%c0_4, %c0_5, %c0_6] : memref<1x8x16xbf16, #tpu.memory_space<vmem>>, vector<1x8x16xbf16>
    %5 = vector.shape_cast %4 : vector<1x8x16xbf16> to vector<8x16xbf16>
    %6 = arith.truncf %3 : vector<16x64xf32> to vector<16x64xbf16>
    %cst_7 = arith.constant dense<0.000000e+00> : vector<8x64xf32>
    %7 = tpu.matmul %5, %6, %cst_7 {dimension_numbers = #tpu.dot_dimension_numbers<[1], [0], [0], [1], [0, 0, 1, 1], [], []>} : vector<8x16xbf16>, vector<16x64xbf16>, vector<8x64xf32> -> vector<8x64xf32>
    %c0_8 = arith.constant 0 : index
    %c0_9 = arith.constant 0 : index
    %c0_10 = arith.constant 0 : index
    %8 = vector.load %arg2[%c0_8, %c0_9, %c0_10] : memref<1x16x8xbf16, #tpu.memory_space<vmem>>, vector<1x16x8xbf16>
    %9 = vector.shape_cast %8 : vector<1x16x8xbf16> to vector<16x8xbf16>
    %10 = arith.truncf %7 : vector<8x64xf32> to vector<8x64xbf16>
    %cst_11 = arith.constant dense<0.000000e+00> : vector<16x64xf32>
    %11 = tpu.matmul %9, %10, %cst_11 {dimension_numbers = #tpu.dot_dimension_numbers<[1], [0], [0], [1], [0, 0, 1, 1], [], []>} : vector<16x8xbf16>, vector<8x64xbf16>, vector<16x64xf32> -> vector<16x64xf32>
    %c0_12 = arith.constant 0 : index
    %c0_13 = arith.constant 0 : index
    %12 = vector.load %arg5[%c0_12, %c0_13] : memref<1x64xf32, #tpu.memory_space<vmem>>, vector<1x64xf32>
    %13 = vector.broadcast %12 : vector<1x64xf32> to vector<16x64xf32>
    %14 = arith.addf %11, %13 : vector<16x64xf32>
    %c0_14 = arith.constant 0 : index
    %c0_15 = arith.constant 0 : index
    %c0_16 = arith.constant 0 : index
    %15 = vector.load %arg7[%c0_14, %c0_15, %c0_16] : memref<1x8x64xf32, #tpu.memory_space<vmem>>, vector<1x8x64xf32>
    %16 = vector.shape_cast %15 : vector<1x8x64xf32> to vector<8x64xf32>
    %17 = vector.shape_cast %7 : vector<8x64xf32> to vector<1x8x64xf32>
    tpu.vector_store %arg7[%c0_14, %c0_15, %c0_16], %17 {strides = array<i32>} : memref<1x8x64xf32, #tpu.memory_space<vmem>>, vector<1x8x64xf32>,
    %c0_17 = arith.constant 0 : index
    %c0_18 = arith.constant 0 : index
    %c0_19 = arith.constant 0 : index
    %18 = vector.load %arg6[%c0_17, %c0_18, %c0_19] : memref<1x16x64xf32, #tpu.memory_space<vmem>>, vector<1x16x64xf32>
    %19 = vector.shape_cast %18 : vector<1x16x64xf32> to vector<16x64xf32>
    %20 = vector.shape_cast %14 : vector<16x64xf32> to vector<1x16x64xf32>
    tpu.vector_store %arg6[%c0_17, %c0_18, %c0_19], %20 {strides = array<i32>} : memref<1x16x64xf32, #tpu.memory_space<vmem>>, vector<1x16x64xf32>,
    return
  }
  func.func @transform_0(%arg0: i32) -> (i32, i32, i32) {
    %c0_i32 = arith.constant 0 : i32
    %c0_i32_0 = arith.constant 0 : i32
    %c0_i32_1 = arith.constant 0 : i32
    return %arg0, %c0_i32, %c0_i32_0 : i32, i32, i32
  }
  func.func @transform_1(%arg0: i32) -> (i32, i32, i32) {
    %c0_i32 = arith.constant 0 : i32
    %c0_i32_0 = arith.constant 0 : i32
    %c0_i32_1 = arith.constant 0 : i32
    return %arg0, %c0_i32, %c0_i32_0 : i32, i32, i32
  }
  func.func @transform_2(%arg0: i32) -> (i32, i32, i32) {
    %c0_i32 = arith.constant 0 : i32
    %c0_i32_0 = arith.constant 0 : i32
    %c0_i32_1 = arith.constant 0 : i32
    return %arg0, %c0_i32, %c0_i32_0 : i32, i32, i32
  }
  func.func @transform_3(%arg0: i32) -> (i32, i32) {
    %c0_i32 = arith.constant 0 : i32
    %c0_i32_0 = arith.constant 0 : i32
    %c0_i32_1 = arith.constant 0 : i32
    return %c0_i32, %c0_i32_0 : i32, i32
  }
  func.func @transform_4(%arg0: i32) -> (i32, i32) {
    %c0_i32 = arith.constant 0 : i32
    %c0_i32_0 = arith.constant 0 : i32
    %c0_i32_1 = arith.constant 0 : i32
    return %c0_i32, %c0_i32_0 : i32, i32
  }
  func.func @transform_5(%arg0: i32) -> (i32, i32, i32) {
    %c0_i32 = arith.constant 0 : i32
    %c0_i32_0 = arith.constant 0 : i32
    %c0_i32_1 = arith.constant 0 : i32
    return %arg0, %c0_i32, %c0_i32_0 : i32, i32, i32
  }
  func.func @transform_6(%arg0: i32) -> (i32, i32, i32) {
    %c0_i32 = arith.constant 0 : i32
    %c0_i32_0 = arith.constant 0 : i32
    %c0_i32_1 = arith.constant 0 : i32
    return %arg0, %c0_i32, %c0_i32_0 : i32, i32, i32
  }
}

module attributes {stable_mosaic.version = 11 : i64} {
  func.func @_hgconv_layer_kernel(%arg0: i32, %arg1: memref<1x8x16xbf16, #tpu.memory_space<vmem>>, %arg2: memref<1x16x8xbf16, #tpu.memory_space<vmem>>, %arg3: memref<1x16x64xbf16, #tpu.memory_space<vmem>>, %arg4: memref<64x64xbf16, #tpu.memory_space<vmem>>, %arg5: memref<1x64xf32, #tpu.memory_space<vmem>>, %arg6: memref<1x16x64xf32, #tpu.memory_space<vmem>>, %arg7: memref<1x8x64xf32, #tpu.memory_space<vmem>>) attributes {dimension_semantics = [#tpu.dimension_semantics<parallel>], iteration_bounds = array<i64: 8>, scalar_prefetch = 0 : i64, scratch_operands = 0 : i64, tpu.core_type = #tpu.core_type<tc>, window_params = [{transform_indices = @transform_0, window_bounds = array<i64: 1, 8, 16>}, {transform_indices = @transform_1, window_bounds = array<i64: 1, 16, 8>}, {transform_indices = @transform_2, window_bounds = array<i64: 1, 16, 64>}, {pipeline_mode = #tpu.pipeline_mode<synchronous>, transform_indices = @transform_3, window_bounds = array<i64: 64, 64>}, {pipeline_mode = #tpu.pipeline_mode<synchronous>, transform_indices = @transform_4, window_bounds = array<i64: 1, 64>}, {transform_indices = @transform_5, window_bounds = array<i64: 1, 16, 64>}, {transform_indices = @transform_6, window_bounds = array<i64: 1, 8, 64>}]} {
    %c0 = arith.constant 0 : index
    %c0_0 = arith.constant 0 : index
    %c0_1 = arith.constant 0 : index
    %0 = vector.load %arg3[%c0, %c0_0, %c0_1] : memref<1x16x64xbf16, #tpu.memory_space<vmem>>, vector<1x16x64xbf16>
    %1 = vector.shape_cast %0 : vector<1x16x64xbf16> to vector<16x64xbf16>
    %c0_2 = arith.constant 0 : index
    %c0_3 = arith.constant 0 : index
    %2 = vector.load %arg4[%c0_2, %c0_3] : memref<64x64xbf16, #tpu.memory_space<vmem>>, vector<64x64xbf16>
    %cst = arith.constant dense<0.000000e+00> : vector<16x64xf32>
    %3 = tpu.matmul %1, %2, %cst {dimension_numbers = #tpu.dot_dimension_numbers<[1], [0], [0], [1], [0, 0, 1, 1], [], []>} : vector<16x64xbf16>, vector<64x64xbf16>, vector<16x64xf32> -> vector<16x64xf32>
    %c0_4 = arith.constant 0 : index
    %c0_5 = arith.constant 0 : index
    %c0_6 = arith.constant 0 : index
    %4 = vector.load %arg1[%c0_4, %c0_5, %c0_6] : memref<1x8x16xbf16, #tpu.memory_space<vmem>>, vector<1x8x16xbf16>
    %5 = vector.shape_cast %4 : vector<1x8x16xbf16> to vector<8x16xbf16>
    %6 = arith.truncf %3 : vector<16x64xf32> to vector<16x64xbf16>
    %cst_7 = arith.constant dense<0.000000e+00> : vector<8x64xf32>
    %7 = tpu.matmul %5, %6, %cst_7 {dimension_numbers = #tpu.dot_dimension_numbers<[1], [0], [0], [1], [0, 0, 1, 1], [], []>} : vector<8x16xbf16>, vector<16x64xbf16>, vector<8x64xf32> -> vector<8x64xf32>
    %c0_8 = arith.constant 0 : index
    %c0_9 = arith.constant 0 : index
    %c0_10 = arith.constant 0 : index
    %8 = vector.load %arg2[%c0_8, %c0_9, %c0_10] : memref<1x16x8xbf16, #tpu.memory_space<vmem>>, vector<1x16x8xbf16>
    %9 = vector.shape_cast %8 : vector<1x16x8xbf16> to vector<16x8xbf16>
    %10 = arith.truncf %7 : vector<8x64xf32> to vector<8x64xbf16>
    %cst_11 = arith.constant dense<0.000000e+00> : vector<16x64xf32>
    %11 = tpu.matmul %9, %10, %cst_11 {dimension_numbers = #tpu.dot_dimension_numbers<[1], [0], [0], [1], [0, 0, 1, 1], [], []>} : vector<16x8xbf16>, vector<8x64xbf16>, vector<16x64xf32> -> vector<16x64xf32>
    %c0_12 = arith.constant 0 : index
    %c0_13 = arith.constant 0 : index
    %12 = vector.load %arg5[%c0_12, %c0_13] : memref<1x64xf32, #tpu.memory_space<vmem>>, vector<1x64xf32>
    %13 = vector.broadcast %12 : vector<1x64xf32> to vector<16x64xf32>
    %14 = arith.addf %11, %13 : vector<16x64xf32>
    %c0_14 = arith.constant 0 : index
    %c0_15 = arith.constant 0 : index
    %c0_16 = arith.constant 0 : index
    %15 = vector.load %arg7[%c0_14, %c0_15, %c0_16] : memref<1x8x64xf32, #tpu.memory_space<vmem>>, vector<1x8x64xf32>
    %16 = vector.shape_cast %15 : vector<1x8x64xf32> to vector<8x64xf32>
    %17 = vector.shape_cast %7 : vector<8x64xf32> to vector<1x8x64xf32>
    tpu.vector_store %arg7[%c0_14, %c0_15, %c0_16], %17 {strides = array<i32>} : memref<1x8x64xf32, #tpu.memory_space<vmem>>, vector<1x8x64xf32>,
    %c0_17 = arith.constant 0 : index
    %c0_18 = arith.constant 0 : index
    %c0_19 = arith.constant 0 : index
    %18 = vector.load %arg6[%c0_17, %c0_18, %c0_19] : memref<1x16x64xf32, #tpu.memory_space<vmem>>, vector<1x16x64xf32>
    %19 = vector.shape_cast %18 : vector<1x16x64xf32> to vector<16x64xf32>
    %20 = vector.shape_cast %14 : vector<16x64xf32> to vector<1x16x64xf32>
    tpu.vector_store %arg6[%c0_17, %c0_18, %c0_19], %20 {strides = array<i32>} : memref<1x16x64xf32, #tpu.memory_space<vmem>>, vector<1x16x64xf32>,
    return
  }
  func.func @transform_0(%arg0: i32) -> (i32, i32, i32) {
    %c0_i32 = arith.constant 0 : i32
    %c0_i32_0 = arith.constant 0 : i32
    %c0_i32_1 = arith.constant 0 : i32
    return %arg0, %c0_i32, %c0_i32_0 : i32, i32, i32
  }
  func.func @transform_1(%arg0: i32) -> (i32, i32, i32) {
    %c0_i32 = arith.constant 0 : i32
    %c0_i32_0 = arith.constant 0 : i32
    %c0_i32_1 = arith.constant 0 : i32
    return %arg0, %c0_i32, %c0_i32_0 : i32, i32, i32
  }
  func.func @transform_2(%arg0: i32) -> (i32, i32, i32) {
    %c0_i32 = arith.constant 0 : i32
    %c0_i32_0 = arith.constant 0 : i32
    %c0_i32_1 = arith.constant 0 : i32
    return %arg0, %c0_i32, %c0_i32_0 : i32, i32, i32
  }
  func.func @transform_3(%arg0: i32) -> (i32, i32) {
    %c0_i32 = arith.constant 0 : i32
    %c0_i32_0 = arith.constant 0 : i32
    %c0_i32_1 = arith.constant 0 : i32
    return %c0_i32, %c0_i32_0 : i32, i32
  }
  func.func @transform_4(%arg0: i32) -> (i32, i32) {
    %c0_i32 = arith.constant 0 : i32
    %c0_i32_0 = arith.constant 0 : i32
    %c0_i32_1 = arith.constant 0 : i32
    return %c0_i32, %c0_i32_0 : i32, i32
  }
  func.func @transform_5(%arg0: i32) -> (i32, i32, i32) {
    %c0_i32 = arith.constant 0 : i32
    %c0_i32_0 = arith.constant 0 : i32
    %c0_i32_1 = arith.constant 0 : i32
    return %arg0, %c0_i32, %c0_i32_0 : i32, i32, i32
  }
  func.func @transform_6(%arg0: i32) -> (i32, i32, i32) {
    %c0_i32 = arith.constant 0 : i32
    %c0_i32_0 = arith.constant 0 : i32
    %c0_i32_1 = arith.constant 0 : i32
    return %arg0, %c0_i32, %c0_i32_0 : i32, i32, i32
  }
}

module attributes {stable_mosaic.version = 11 : i64} {
  func.func @_mm_fused_kernel(%arg0: i32, %arg1: i32, %arg2: memref<16x256xbf16, #tpu.memory_space<vmem>>, %arg3: memref<256x256xbf16, #tpu.memory_space<vmem>>, %arg4: memref<16x32xbf16, #tpu.memory_space<vmem>>, %arg5: memref<32x256xbf16, #tpu.memory_space<vmem>>, %arg6: memref<1x256xf32, #tpu.memory_space<vmem>>, %arg7: memref<16x256xf32, #tpu.memory_space<vmem>>) attributes {dimension_semantics = [#tpu.dimension_semantics<parallel>, #tpu.dimension_semantics<parallel>], iteration_bounds = array<i64: 2, 1>, scalar_prefetch = 0 : i64, scratch_operands = 0 : i64, tpu.core_type = #tpu.core_type<tc>, window_params = [{transform_indices = @transform_0, window_bounds = array<i64: 16, 256>}, {transform_indices = @transform_1, window_bounds = array<i64: 256, 256>}, {transform_indices = @transform_2, window_bounds = array<i64: 16, 32>}, {transform_indices = @transform_3, window_bounds = array<i64: 32, 256>}, {transform_indices = @transform_4, window_bounds = array<i64: 1, 256>}, {transform_indices = @transform_5, window_bounds = array<i64: 16, 256>}]} {
    %c0 = arith.constant 0 : index
    %c0_0 = arith.constant 0 : index
    %0 = vector.load %arg2[%c0, %c0_0] : memref<16x256xbf16, #tpu.memory_space<vmem>>, vector<16x256xbf16>
    %c0_1 = arith.constant 0 : index
    %c0_2 = arith.constant 0 : index
    %1 = vector.load %arg3[%c0_1, %c0_2] : memref<256x256xbf16, #tpu.memory_space<vmem>>, vector<256x256xbf16>
    %cst = arith.constant dense<0.000000e+00> : vector<16x256xf32>
    %2 = tpu.matmul %0, %1, %cst {dimension_numbers = #tpu.dot_dimension_numbers<[1], [0], [0], [1], [0, 0, 1, 1], [], []>} : vector<16x256xbf16>, vector<256x256xbf16>, vector<16x256xf32> -> vector<16x256xf32>
    %c0_3 = arith.constant 0 : index
    %c0_4 = arith.constant 0 : index
    %3 = vector.load %arg4[%c0_3, %c0_4] : memref<16x32xbf16, #tpu.memory_space<vmem>>, vector<16x32xbf16>
    %c0_5 = arith.constant 0 : index
    %c0_6 = arith.constant 0 : index
    %4 = vector.load %arg5[%c0_5, %c0_6] : memref<32x256xbf16, #tpu.memory_space<vmem>>, vector<32x256xbf16>
    %cst_7 = arith.constant dense<0.000000e+00> : vector<16x256xf32>
    %5 = tpu.matmul %3, %4, %cst_7 {dimension_numbers = #tpu.dot_dimension_numbers<[1], [0], [0], [1], [0, 0, 1, 1], [], []>} : vector<16x32xbf16>, vector<32x256xbf16>, vector<16x256xf32> -> vector<16x256xf32>
    %6 = arith.addf %2, %5 : vector<16x256xf32>
    %c0_8 = arith.constant 0 : index
    %c0_9 = arith.constant 0 : index
    %7 = vector.load %arg6[%c0_8, %c0_9] : memref<1x256xf32, #tpu.memory_space<vmem>>, vector<1x256xf32>
    %8 = vector.broadcast %7 : vector<1x256xf32> to vector<16x256xf32>
    %9 = arith.addf %6, %8 : vector<16x256xf32>
    %cst_10 = arith.constant 0.000000e+00 : f32
    %10 = vector.broadcast %cst_10 : f32 to vector<16x256xf32>
    %11 = arith.maximumf %9, %10 : vector<16x256xf32>
    %c0_11 = arith.constant 0 : index
    %c0_12 = arith.constant 0 : index
    %12 = vector.load %arg7[%c0_11, %c0_12] : memref<16x256xf32, #tpu.memory_space<vmem>>, vector<16x256xf32>
    tpu.vector_store %arg7[%c0_11, %c0_12], %11 {strides = array<i32>} : memref<16x256xf32, #tpu.memory_space<vmem>>, vector<16x256xf32>,
    return
  }
  func.func @transform_0(%arg0: i32, %arg1: i32) -> (i32, i32) {
    %c0_i32 = arith.constant 0 : i32
    %c0_i32_0 = arith.constant 0 : i32
    return %arg0, %c0_i32 : i32, i32
  }
  func.func @transform_1(%arg0: i32, %arg1: i32) -> (i32, i32) {
    %c0_i32 = arith.constant 0 : i32
    %c0_i32_0 = arith.constant 0 : i32
    return %c0_i32, %arg1 : i32, i32
  }
  func.func @transform_2(%arg0: i32, %arg1: i32) -> (i32, i32) {
    %c0_i32 = arith.constant 0 : i32
    %c0_i32_0 = arith.constant 0 : i32
    return %arg0, %c0_i32 : i32, i32
  }
  func.func @transform_3(%arg0: i32, %arg1: i32) -> (i32, i32) {
    %c0_i32 = arith.constant 0 : i32
    %c0_i32_0 = arith.constant 0 : i32
    return %c0_i32, %arg1 : i32, i32
  }
  func.func @transform_4(%arg0: i32, %arg1: i32) -> (i32, i32) {
    %c0_i32 = arith.constant 0 : i32
    %c0_i32_0 = arith.constant 0 : i32
    return %c0_i32, %arg1 : i32, i32
  }
  func.func @transform_5(%arg0: i32, %arg1: i32) -> (i32, i32) {
    %c0_i32 = arith.constant 0 : i32
    return %arg0, %arg1 : i32, i32
  }
}

module attributes {stable_mosaic.version = 11 : i64} {
  func.func @_mm_fused_kernel(%arg0: i32, %arg1: i32, %arg2: memref<16x24xbf16, #tpu.memory_space<vmem>>, %arg3: memref<24x1xbf16, #tpu.memory_space<vmem>>, %arg4: memref<1x1xf32, #tpu.memory_space<vmem>>, %arg5: memref<16x1xf32, #tpu.memory_space<vmem>>) attributes {dimension_semantics = [#tpu.dimension_semantics<parallel>, #tpu.dimension_semantics<parallel>], iteration_bounds = array<i64: 2, 1>, scalar_prefetch = 0 : i64, scratch_operands = 0 : i64, tpu.core_type = #tpu.core_type<tc>, window_params = [{transform_indices = @transform_0, window_bounds = array<i64: 16, 24>}, {transform_indices = @transform_1, window_bounds = array<i64: 24, 1>}, {transform_indices = @transform_2, window_bounds = array<i64: 1, 1>}, {transform_indices = @transform_3, window_bounds = array<i64: 16, 1>}]} {
    %c0 = arith.constant 0 : index
    %c0_0 = arith.constant 0 : index
    %0 = vector.load %arg2[%c0, %c0_0] : memref<16x24xbf16, #tpu.memory_space<vmem>>, vector<16x24xbf16>
    %c0_1 = arith.constant 0 : index
    %c0_2 = arith.constant 0 : index
    %1 = vector.load %arg3[%c0_1, %c0_2] : memref<24x1xbf16, #tpu.memory_space<vmem>>, vector<24x1xbf16>
    %cst = arith.constant dense<0.000000e+00> : vector<16x1xf32>
    %2 = tpu.matmul %0, %1, %cst {dimension_numbers = #tpu.dot_dimension_numbers<[1], [0], [0], [1], [0, 0, 1, 1], [], []>} : vector<16x24xbf16>, vector<24x1xbf16>, vector<16x1xf32> -> vector<16x1xf32>
    %c0_3 = arith.constant 0 : index
    %c0_4 = arith.constant 0 : index
    %3 = vector.load %arg4[%c0_3, %c0_4] : memref<1x1xf32, #tpu.memory_space<vmem>>, vector<1x1xf32>
    %4 = vector.broadcast %3 : vector<1x1xf32> to vector<16x1xf32>
    %5 = arith.addf %2, %4 : vector<16x1xf32>
    %c0_5 = arith.constant 0 : index
    %c0_6 = arith.constant 0 : index
    %6 = vector.load %arg5[%c0_5, %c0_6] : memref<16x1xf32, #tpu.memory_space<vmem>>, vector<16x1xf32>
    tpu.vector_store %arg5[%c0_5, %c0_6], %5 {strides = array<i32>} : memref<16x1xf32, #tpu.memory_space<vmem>>, vector<16x1xf32>,
    return
  }
  func.func @transform_0(%arg0: i32, %arg1: i32) -> (i32, i32) {
    %c0_i32 = arith.constant 0 : i32
    %c0_i32_0 = arith.constant 0 : i32
    return %arg0, %c0_i32 : i32, i32
  }
  func.func @transform_1(%arg0: i32, %arg1: i32) -> (i32, i32) {
    %c0_i32 = arith.constant 0 : i32
    %c0_i32_0 = arith.constant 0 : i32
    return %c0_i32, %arg1 : i32, i32
  }
  func.func @transform_2(%arg0: i32, %arg1: i32) -> (i32, i32) {
    %c0_i32 = arith.constant 0 : i32
    %c0_i32_0 = arith.constant 0 : i32
    return %c0_i32, %arg1 : i32, i32
  }
  func.func @transform_3(%arg0: i32, %arg1: i32) -> (i32, i32) {
    %c0_i32 = arith.constant 0 : i32
    return %arg0, %arg1 : i32, i32
  }
}

module attributes {stable_mosaic.version = 11 : i64} {
  func.func @_mm_fused_kernel(%arg0: i32, %arg1: i32, %arg2: memref<16x224xbf16, #tpu.memory_space<vmem>>, %arg3: memref<224x160xbf16, #tpu.memory_space<vmem>>, %arg4: memref<1x160xf32, #tpu.memory_space<vmem>>, %arg5: memref<16x160xf32, #tpu.memory_space<vmem>>) attributes {dimension_semantics = [#tpu.dimension_semantics<parallel>, #tpu.dimension_semantics<parallel>], iteration_bounds = array<i64: 2, 1>, scalar_prefetch = 0 : i64, scratch_operands = 0 : i64, tpu.core_type = #tpu.core_type<tc>, window_params = [{transform_indices = @transform_0, window_bounds = array<i64: 16, 224>}, {transform_indices = @transform_1, window_bounds = array<i64: 224, 160>}, {transform_indices = @transform_2, window_bounds = array<i64: 1, 160>}, {transform_indices = @transform_3, window_bounds = array<i64: 16, 160>}]} {
    %c0 = arith.constant 0 : index
    %c0_0 = arith.constant 0 : index
    %0 = vector.load %arg2[%c0, %c0_0] : memref<16x224xbf16, #tpu.memory_space<vmem>>, vector<16x224xbf16>
    %c0_1 = arith.constant 0 : index
    %c0_2 = arith.constant 0 : index
    %1 = vector.load %arg3[%c0_1, %c0_2] : memref<224x160xbf16, #tpu.memory_space<vmem>>, vector<224x160xbf16>
    %cst = arith.constant dense<0.000000e+00> : vector<16x160xf32>
    %2 = tpu.matmul %0, %1, %cst {dimension_numbers = #tpu.dot_dimension_numbers<[1], [0], [0], [1], [0, 0, 1, 1], [], []>} : vector<16x224xbf16>, vector<224x160xbf16>, vector<16x160xf32> -> vector<16x160xf32>
    %c0_3 = arith.constant 0 : index
    %c0_4 = arith.constant 0 : index
    %3 = vector.load %arg4[%c0_3, %c0_4] : memref<1x160xf32, #tpu.memory_space<vmem>>, vector<1x160xf32>
    %4 = vector.broadcast %3 : vector<1x160xf32> to vector<16x160xf32>
    %5 = arith.addf %2, %4 : vector<16x160xf32>
    %c0_5 = arith.constant 0 : index
    %c0_6 = arith.constant 0 : index
    %6 = vector.load %arg5[%c0_5, %c0_6] : memref<16x160xf32, #tpu.memory_space<vmem>>, vector<16x160xf32>
    tpu.vector_store %arg5[%c0_5, %c0_6], %5 {strides = array<i32>} : memref<16x160xf32, #tpu.memory_space<vmem>>, vector<16x160xf32>,
    return
  }
  func.func @transform_0(%arg0: i32, %arg1: i32) -> (i32, i32) {
    %c0_i32 = arith.constant 0 : i32
    %c0_i32_0 = arith.constant 0 : i32
    return %arg0, %c0_i32 : i32, i32
  }
  func.func @transform_1(%arg0: i32, %arg1: i32) -> (i32, i32) {
    %c0_i32 = arith.constant 0 : i32
    %c0_i32_0 = arith.constant 0 : i32
    return %c0_i32, %arg1 : i32, i32
  }
  func.func @transform_2(%arg0: i32, %arg1: i32) -> (i32, i32) {
    %c0_i32 = arith.constant 0 : i32
    %c0_i32_0 = arith.constant 0 : i32
    return %c0_i32, %arg1 : i32, i32
  }
  func.func @transform_3(%arg0: i32, %arg1: i32) -> (i32, i32) {
    %c0_i32 = arith.constant 0 : i32
    return %arg0, %arg1 : i32, i32
  }
}

module attributes {stable_mosaic.version = 11 : i64} {
  func.func @_mm_fused_kernel(%arg0: i32, %arg1: i32, %arg2: memref<8x224xbf16, #tpu.memory_space<vmem>>, %arg3: memref<224x160xbf16, #tpu.memory_space<vmem>>, %arg4: memref<1x160xf32, #tpu.memory_space<vmem>>, %arg5: memref<8x160xf32, #tpu.memory_space<vmem>>) attributes {dimension_semantics = [#tpu.dimension_semantics<parallel>, #tpu.dimension_semantics<parallel>], iteration_bounds = array<i64: 2, 1>, scalar_prefetch = 0 : i64, scratch_operands = 0 : i64, tpu.core_type = #tpu.core_type<tc>, window_params = [{transform_indices = @transform_0, window_bounds = array<i64: 8, 224>}, {transform_indices = @transform_1, window_bounds = array<i64: 224, 160>}, {transform_indices = @transform_2, window_bounds = array<i64: 1, 160>}, {transform_indices = @transform_3, window_bounds = array<i64: 8, 160>}]} {
    %c0 = arith.constant 0 : index
    %c0_0 = arith.constant 0 : index
    %0 = vector.load %arg2[%c0, %c0_0] : memref<8x224xbf16, #tpu.memory_space<vmem>>, vector<8x224xbf16>
    %c0_1 = arith.constant 0 : index
    %c0_2 = arith.constant 0 : index
    %1 = vector.load %arg3[%c0_1, %c0_2] : memref<224x160xbf16, #tpu.memory_space<vmem>>, vector<224x160xbf16>
    %cst = arith.constant dense<0.000000e+00> : vector<8x160xf32>
    %2 = tpu.matmul %0, %1, %cst {dimension_numbers = #tpu.dot_dimension_numbers<[1], [0], [0], [1], [0, 0, 1, 1], [], []>} : vector<8x224xbf16>, vector<224x160xbf16>, vector<8x160xf32> -> vector<8x160xf32>
    %c0_3 = arith.constant 0 : index
    %c0_4 = arith.constant 0 : index
    %3 = vector.load %arg4[%c0_3, %c0_4] : memref<1x160xf32, #tpu.memory_space<vmem>>, vector<1x160xf32>
    %4 = vector.broadcast %3 : vector<1x160xf32> to vector<8x160xf32>
    %5 = arith.addf %2, %4 : vector<8x160xf32>
    %c0_5 = arith.constant 0 : index
    %c0_6 = arith.constant 0 : index
    %6 = vector.load %arg5[%c0_5, %c0_6] : memref<8x160xf32, #tpu.memory_space<vmem>>, vector<8x160xf32>
    tpu.vector_store %arg5[%c0_5, %c0_6], %5 {strides = array<i32>} : memref<8x160xf32, #tpu.memory_space<vmem>>, vector<8x160xf32>,
    return
  }
  func.func @transform_0(%arg0: i32, %arg1: i32) -> (i32, i32) {
    %c0_i32 = arith.constant 0 : i32
    %c0_i32_0 = arith.constant 0 : i32
    return %arg0, %c0_i32 : i32, i32
  }
  func.func @transform_1(%arg0: i32, %arg1: i32) -> (i32, i32) {
    %c0_i32 = arith.constant 0 : i32
    %c0_i32_0 = arith.constant 0 : i32
    return %c0_i32, %arg1 : i32, i32
  }
  func.func @transform_2(%arg0: i32, %arg1: i32) -> (i32, i32) {
    %c0_i32 = arith.constant 0 : i32
    %c0_i32_0 = arith.constant 0 : i32
    return %c0_i32, %arg1 : i32, i32
  }
  func.func @transform_3(%arg0: i32, %arg1: i32) -> (i32, i32) {
    %c0_i32 = arith.constant 0 : i32
    return %arg0, %arg1 : i32, i32
  }
}

module attributes {stable_mosaic.version = 11 : i64} {
  func.func @_mlp2_kernel(%arg0: i32, %arg1: memref<40x160xbf16, #tpu.memory_space<vmem>>, %arg2: memref<160x32xbf16, #tpu.memory_space<vmem>>, %arg3: memref<1x32xf32, #tpu.memory_space<vmem>>, %arg4: memref<1x32xf32, #tpu.memory_space<vmem>>, %arg5: memref<1x1xf32, #tpu.memory_space<vmem>>, %arg6: memref<40x1xf32, #tpu.memory_space<vmem>>) attributes {dimension_semantics = [#tpu.dimension_semantics<parallel>], iteration_bounds = array<i64: 2>, scalar_prefetch = 0 : i64, scratch_operands = 0 : i64, tpu.core_type = #tpu.core_type<tc>, window_params = [{transform_indices = @transform_0, window_bounds = array<i64: 40, 160>}, {pipeline_mode = #tpu.pipeline_mode<synchronous>, transform_indices = @transform_1, window_bounds = array<i64: 160, 32>}, {pipeline_mode = #tpu.pipeline_mode<synchronous>, transform_indices = @transform_2, window_bounds = array<i64: 1, 32>}, {pipeline_mode = #tpu.pipeline_mode<synchronous>, transform_indices = @transform_3, window_bounds = array<i64: 1, 32>}, {pipeline_mode = #tpu.pipeline_mode<synchronous>, transform_indices = @transform_4, window_bounds = array<i64: 1, 1>}, {transform_indices = @transform_5, window_bounds = array<i64: 40, 1>}]} {
    %c0 = arith.constant 0 : index
    %c0_0 = arith.constant 0 : index
    %0 = vector.load %arg1[%c0, %c0_0] : memref<40x160xbf16, #tpu.memory_space<vmem>>, vector<40x160xbf16>
    %c0_1 = arith.constant 0 : index
    %c0_2 = arith.constant 0 : index
    %1 = vector.load %arg2[%c0_1, %c0_2] : memref<160x32xbf16, #tpu.memory_space<vmem>>, vector<160x32xbf16>
    %cst = arith.constant dense<0.000000e+00> : vector<40x32xf32>
    %2 = tpu.matmul %0, %1, %cst {dimension_numbers = #tpu.dot_dimension_numbers<[1], [0], [0], [1], [0, 0, 1, 1], [], []>} : vector<40x160xbf16>, vector<160x32xbf16>, vector<40x32xf32> -> vector<40x32xf32>
    %c0_3 = arith.constant 0 : index
    %c0_4 = arith.constant 0 : index
    %3 = vector.load %arg3[%c0_3, %c0_4] : memref<1x32xf32, #tpu.memory_space<vmem>>, vector<1x32xf32>
    %4 = vector.broadcast %3 : vector<1x32xf32> to vector<40x32xf32>
    %5 = arith.addf %2, %4 : vector<40x32xf32>
    %cst_5 = arith.constant 0.000000e+00 : f32
    %6 = vector.broadcast %cst_5 : f32 to vector<40x32xf32>
    %7 = arith.maximumf %5, %6 : vector<40x32xf32>
    %c0_6 = arith.constant 0 : index
    %c0_7 = arith.constant 0 : index
    %8 = vector.load %arg4[%c0_6, %c0_7] : memref<1x32xf32, #tpu.memory_space<vmem>>, vector<1x32xf32>
    %9 = vector.broadcast %8 : vector<1x32xf32> to vector<40x32xf32>
    %10 = arith.mulf %7, %9 : vector<40x32xf32>
    %cst_8 = arith.constant dense<0.000000e+00> : vector<40xf32>
    %11 = vector.multi_reduction <add>, %10, %cst_8 [1] : vector<40x32xf32> to vector<40xf32>
    %12 = vector.shape_cast %11 : vector<40xf32> to vector<40x1xf32>
    %c0_9 = arith.constant 0 : index
    %c0_10 = arith.constant 0 : index
    %13 = vector.load %arg5[%c0_9, %c0_10] : memref<1x1xf32, #tpu.memory_space<vmem>>, vector<1x1xf32>
    %14 = vector.broadcast %13 : vector<1x1xf32> to vector<40x1xf32>
    %15 = arith.addf %12, %14 : vector<40x1xf32>
    %c0_11 = arith.constant 0 : index
    %c0_12 = arith.constant 0 : index
    %16 = vector.load %arg6[%c0_11, %c0_12] : memref<40x1xf32, #tpu.memory_space<vmem>>, vector<40x1xf32>
    tpu.vector_store %arg6[%c0_11, %c0_12], %15 {strides = array<i32>} : memref<40x1xf32, #tpu.memory_space<vmem>>, vector<40x1xf32>,
    return
  }
  func.func @transform_0(%arg0: i32) -> (i32, i32) {
    %c0_i32 = arith.constant 0 : i32
    %c0_i32_0 = arith.constant 0 : i32
    return %arg0, %c0_i32 : i32, i32
  }
  func.func @transform_1(%arg0: i32) -> (i32, i32) {
    %c0_i32 = arith.constant 0 : i32
    %c0_i32_0 = arith.constant 0 : i32
    %c0_i32_1 = arith.constant 0 : i32
    return %c0_i32, %c0_i32_0 : i32, i32
  }
  func.func @transform_2(%arg0: i32) -> (i32, i32) {
    %c0_i32 = arith.constant 0 : i32
    %c0_i32_0 = arith.constant 0 : i32
    %c0_i32_1 = arith.constant 0 : i32
    return %c0_i32, %c0_i32_0 : i32, i32
  }
  func.func @transform_3(%arg0: i32) -> (i32, i32) {
    %c0_i32 = arith.constant 0 : i32
    %c0_i32_0 = arith.constant 0 : i32
    %c0_i32_1 = arith.constant 0 : i32
    return %c0_i32, %c0_i32_0 : i32, i32
  }
  func.func @transform_4(%arg0: i32) -> (i32, i32) {
    %c0_i32 = arith.constant 0 : i32
    %c0_i32_0 = arith.constant 0 : i32
    %c0_i32_1 = arith.constant 0 : i32
    return %c0_i32, %c0_i32_0 : i32, i32
  }
  func.func @transform_5(%arg0: i32) -> (i32, i32) {
    %c0_i32 = arith.constant 0 : i32
    %c0_i32_0 = arith.constant 0 : i32
    return %arg0, %c0_i32 : i32, i32
  }
}

</mosaic_0001>

<bundles_post_ra>
// kernel: tile.28
= control target key start
LH: loop header
LB: loop body
LE: loop exit
PB: predicated region body
PF: predicated region fallthrough
CT: control target
= control target key end

     0   :  { %s22_s0 = inlined_call_operand.vmem [shape: f32[32], index: 0, kind: input, shape index: {}]   ;;  %s23_s1 = inlined_call_operand.vmem [shape: f32[2,32], index: 1, kind: output, shape index: {}]  }
   0x1   :  { %v4_v0 = vld [vmem:[%s22_s0] ss:$0 sm:$0xff] }
   0x2   :  { %5 = vst [vmem:[%s23_s1] sm:$0x3] %v4_v0 }

// kernel: tile.29
= control target key start
LH: loop header
LB: loop body
LE: loop exit
PB: predicated region body
PF: predicated region fallthrough
CT: control target
= control target key end

     0   :  { %vm8_vm0 = vcmask 261120   ;;  %vm14_vm1 = vcmask 523520   ;;  %s42_s0 = inlined_call_operand.vmem [shape: f32[2,32], index: 0, kind: input, shape index: {}]   ;;  %s43_s1 = inlined_call_operand.vmem [shape: f32[1,64], index: 1, kind: output, shape index: {}]  }
   0x1   :  { %v5_v0 = vld [vmem:[%s42_s0] sm:$0x3]  ;;  %s25_s0 = smov 32  }
   0x2   :  { %6 = vst [vmem:[#allocation1] sm:$0x3] %v5_v0 }
   0x9   :  { %v11_v1 = vld [vmem:[#allocation1 + $0x1] sm:$0x1]   ;;  %v7_v2 = vld [vmem:[#allocation1] sm:$0x1]  }
   0xa   :  { %12 = vrot.lane.b32.xlu0 %v11_v1, %s25_s0  ;;  %9 = vst.msk [vmem:[#allocation0] sm:$0x1] %vm8_vm0, %v7_v2  }
  0x7c   :  { %v13_v3 = vpop.permute.xlu0 %12  }
  0x7d   :  { %15 = vst.msk [vmem:[#allocation0] sm:$0x1] %vm14_vm1, %v13_v3  }
  0x84   :  { %v20_v4 = vld [vmem:[#allocation0] sm:$0x1] }
  0x85   :  { %23 = vst [vmem:[%s43_s1] sm:$0x1] %v20_v4 }

// kernel: dthgnn_forward.8
= control target key start
LH: loop header
LB: loop body
LE: loop exit
PB: predicated region body
PF: predicated region fallthrough
CT: control target
= control target key end

     0   :  { %s730_s21 = smov 0   ;;  %s788_s0 = inlined_call_operand.vmem [shape: bf16[8,8,16], index: 0, kind: input, shape index: {}]   ;;  %s789_s1 = inlined_call_operand.vmem [shape: bf16[8,16,8], index: 1, kind: input, shape index: {}]   ;;  %s790_s2 = inlined_call_operand.vmem [shape: bf16[8,16,64], index: 2, kind: input, shape index: {}]   ;;  %s791_s3 = inlined_call_operand.vmem [shape: bf16[64,64], index: 3, kind: input, shape index: {}]   ;;  %s792_s4 = inlined_call_operand.vmem [shape: f32[1,64], index: 4, kind: input, shape index: {}]   ;;  %s793_s5 = inlined_call_operand.vmem [shape: f32[8,16,64], index: 5, kind: output, shape index: {0}]   ;;  %s794_s6 = inlined_call_operand.vmem [shape: f32[8,8,64], index: 6, kind: output, shape index: {1}]  }
   0x1 LB: > { %s608_s22 = sadd.s32 4294967295, %s691_s21   ;;  %p612_p0 = scmp.ge.s32.totalorder %s691_s21, 1  ;;  %s691_s21 = sphi %s730_s21, %s17_s21  }
   0x2   : > { %p234_p1 = scmp.lt.s32.totalorder %s691_s21, 9 }
   0x4   : > { %p235_p2 = pnand %p612_p0, %p234_p1 }
   0x5   : > { %p277_p3 = scmp.lt.s32.totalorder (!%p235_p2), %s608_s22, 7 }
   0x6   : > { %238 = sbr.rel (%p235_p2) target bundleno = 629 (0x275), region = 40 }
   0xb   : > { %v679_v0 = vld [vmem:[%s791_s3 + $0x18] sm:$0xff]   ;;  %v693_v1 = vmov 0.0   ;;  %v680_v2 = vld [vmem:[%s791_s3 + $0x10] sm:$0xff]   ;;  %vm694_vm0 = vmmov 0   ;;  %s796_s22 = smov (!%p277_p3, %s608_s22), 7  ;;  %v681_v3 = vld [vmem:[%s791_s3 + $0x8] sm:$0xff]  }
   0xc   : > { %645 = vmatprep.subr.bf16.mxu0 %v693_v1  ;;  %657 = vmatprep.subr.bf16.mxu1 %v693_v1  ;;  %s752_s29 = sshll.u32 %s796_s22, 3  ;;  %v682_v4 = vld [vmem:[%s791_s3] sm:$0xff]   ;;  %vm340_vm1 = vcmask 523264   ;;  %s613_s11 = sshll.u32 %s796_s22, 2  ;;  %vm387_vm2 = vcmask 130048   ;;  %vm450_vm3 = vcmask 1043456  }
   0xd   : > { %646 = vmatpush3.bf16.msra.mxu0 %v679_v0  ;;  %653 = vmatprep.mubr.msk.bf16.mxu0 %vm694_vm0, %v693_v1  ;;  %s290_s8 = scalar_lea.vmem %s790_s2, %s752_s29  ;;  %s280_s14 = scalar_lea.vmem %s788_s0, %s613_s11  ;;  %vm446_vm4 = vcmask 64512   ;;  %v628_v19 = vld [vmem:[%s792_s4] ss:$0 sm:$0xff] }
   0xe   : > { %647 = vmatprep.subr.bf16.mxu0 %v693_v1  ;;  %659 = vmatprep.mubr.msk.bf16.mxu1 %vm694_vm0, %v693_v1  ;;  %v683_v5 = vld [vmem:[%s290_s8] sm:$0xff]   ;;  %s285_s17 = scalar_lea.vmem %s789_s1, %s752_s29  ;;  %s299_s20 = scalar_lea.vmem %s794_s6, %s752_s29 }
   0xf   : > { %v385_v11 = vld [vmem:[%s280_s14] sm:$0xf]  ;;  %s635_s23 = sshll.u32 %s796_s22, 4 }
  0x10   : > { %v684_v16 = vld [vmem:[%s285_s17] sm:$0xff]   ;;  %s295_s28 = scalar_lea.vmem %s793_s5, %s635_s23 }
  0x11   : > { %648 = vmatpush3.bf16.msra.mxu0 %v680_v2 }
  0x12   : > { %649 = vmatprep.subr.bf16.mxu0 %v693_v1 }
  0x15   : > { %650 = vmatpush3.bf16.msra.mxu0 %v681_v3 }
  0x16   : > { %651 = vmatprep.subr.bf16.mxu0 %v693_v1 }
  0x19   : > { %652 = vmatpush3.bf16.msra.mxu0 %v682_v4 }
  0x1c   : > { %654 = vmatmul.mubr.msk.bf16.vlgmr.msra.gmra.mxu0 %vm340_vm1, %v683_v5 }
  0xdc   : > { %v378_v6 = vpop.f32.mrf.mxu0 }
  0xde   : > { %v655_v7 = vpop.f32.mrf.mxu0 }
  0xe0   : > { %v381_v8 = vpop.f32.mrf.mxu0 }
  0xe1   : > { %v386_v9 = vpack.c.bf16 %v381_v8, %v378_v6 }
  0xe2   : > { %v656_v10 = vpop.f32.mrf.mxu0 }
  0xe3   : > { %658 = vmatpush3.bf16.msra.mxu1 %v386_v9 }
  0xe4   : > { %663 = vmatprep.subr.bf16.mxu1 %v693_v1 }
  0xe6   : > { %660 = vmatmul.mubr.msk.bf16.vlgmr.msra.gmra.mxu1 %vm387_vm2, %v385_v11 }
  0xe7   : > { %665 = vmatprep.mubr.msk.bf16.mxu1 %vm694_vm0, %v693_v1 }
 0x1a6   : > { %v425_v12 = vpop.f32.mrf.mxu1 }
 0x1a7   : > { %v433_v13 = vpack.c.bf16 %v425_v12, %v425_v12  ;;  %495 = vst.msk [vmem:[%s299_s20] sm:$0xff] %vm340_vm1, %v425_v12 }
 0x1a8   : > { %v661_v14 = vpop.f32.mrf.mxu1 }
 0x1a9   : > { %v452_v15 = vsel %vm450_vm3, %v433_v13, 0 }
 0x1aa   : > { %v428_v17 = vpop.f32.mrf.mxu1  ;;  %664 = vmatpush3.bf16.msra.mxu1 %v452_v15 }
 0x1ac   : > { %v662_v18 = vpop.f32.mrf.mxu1 }
 0x1ad   : > { %666 = vmatmul.mubr.msk.bf16.vlgmr.msra.gmra.mxu1 %vm446_vm4, %v684_v16 }
 0x26d   : > { %v488_v20 = vpop.f32.mrf.mxu1 }
 0x26e   : > { %v489_v21 = vadd.f32 %v628_v19, %v488_v20 }
 0x26f   : > { %v667_v22 = vpop.f32.mrf.mxu1 }
 0x270   : > { %496 = vst.msk [vmem:[%s295_s28] sm:$0xff] %vm340_vm1, %v489_v21 }
 0x271   : > { %v491_v23 = vpop.f32.mrf.mxu1 }
 0x272   : > { %v492_v24 = vadd.f32 %v628_v19, %v491_v23 }
 0x273   : > { %v668_v25 = vpop.f32.mrf.mxu1 }
 0x274   : > { %497 = vst.msk [vmem:[%s295_s28 + $0x8] sm:$0xff] %vm340_vm1, %v492_v24 }
 0x275 PF: > { %s17_s21 = sadd.s32 1, %s691_s21  }
 0x276   : > { %p14_p4 = scmp.ge.s32.totalorder %s17_s21, 10  }
 0x278   :  { %16 = sbr.rel (!%p14_p4) target bundleno = 1 (0x1), region = 88 }

// kernel: dthgnn_forward.7
= control target key start
LH: loop header
LB: loop body
LE: loop exit
PB: predicated region body
PF: predicated region fallthrough
CT: control target
= control target key end

     0   :  { %s691_s21 = smov 0   ;;  %s731_s0 = inlined_call_operand.vmem [shape: bf16[8,8,16], index: 0, kind: input, shape index: {}]   ;;  %s732_s1 = inlined_call_operand.vmem [shape: bf16[8,16,8], index: 1, kind: input, shape index: {}]   ;;  %s733_s2 = inlined_call_operand.vmem [shape: bf16[8,16,16], index: 2, kind: input, shape index: {}]   ;;  %s734_s3 = inlined_call_operand.vmem [shape: bf16[16,64], index: 3, kind: input, shape index: {}]   ;;  %s735_s4 = inlined_call_operand.vmem [shape: f32[1,64], index: 4, kind: input, shape index: {}]   ;;  %s736_s5 = inlined_call_operand.vmem [shape: f32[8,16,64], index: 5, kind: output, shape index: {0}]   ;;  %s737_s6 = inlined_call_operand.vmem [shape: f32[8,8,64], index: 6, kind: output, shape index: {1}]  }
   0x1 LB: > { %s584_s22 = sadd.s32 4294967295, %s652_s21   ;;  %p588_p0 = scmp.ge.s32.totalorder %s652_s21, 1  ;;  %s652_s21 = sphi %s691_s21, %s17_s21  }
   0x2   : > { %p234_p1 = scmp.lt.s32.totalorder %s652_s21, 9 }
   0x4   : > { %p235_p2 = pnand %p588_p0, %p234_p1 }
   0x5   : > { %p277_p3 = scmp.lt.s32.totalorder (!%p235_p2), %s584_s22, 7 }
   0x6   : > { %238 = sbr.rel (%p235_p2) target bundleno = 617 (0x269), region = 40 }
   0xb   : > { %v643_v0 = vld [vmem:[%s734_s3] sm:$0xff]   ;;  %v654_v1 = vmov 0.0   ;;  %vm655_vm0 = vmmov 0   ;;  %s739_s22 = smov (!%p277_p3, %s584_s22), 7  ;;  %vm316_vm1 = vcmask 130048   ;;  %vm470_vm2 = vcmask 523264  }
   0xc   : > { %615 = vmatprep.subr.bf16.mxu0 %v654_v1  ;;  %621 = vmatprep.subr.bf16.mxu1 %v654_v1  ;;  %s606_s25 = sshll.u32 %s739_s22, 3  ;;  %s589_s29 = sshll.u32 %s739_s22, 2  ;;  %vm425_vm3 = vcmask 1043456   ;;  %vm421_vm4 = vcmask 64512   ;;  %v601_v16 = vld [vmem:[%s735_s4] ss:$0 sm:$0xff] }
   0xd   : > { %616 = vmatpush3.bf16.msra.mxu0 %v643_v0  ;;  %617 = vmatprep.mubr.msk.bf16.mxu0 %vm655_vm0, %v654_v1  ;;  %s290_s28 = scalar_lea.vmem %s733_s2, %s606_s25  ;;  %s280_s8 = scalar_lea.vmem %s731_s0, %s589_s29 }
   0xe   : > { %623 = vmatprep.mubr.msk.bf16.mxu1 %vm655_vm0, %v654_v1  ;;  %627 = vmatprep.subr.bf16.mxu0 %v654_v1  ;;  %v644_v2 = vld [vmem:[%s290_s28] sm:$0xff]   ;;  %s285_s11 = scalar_lea.vmem %s732_s1, %s606_s25  ;;  %s299_s14 = scalar_lea.vmem %s737_s6, %s606_s25 }
   0xf   : > { %v361_v8 = vld [vmem:[%s280_s8] sm:$0xf]  ;;  %s608_s15 = sshll.u32 %s739_s22, 4 }
  0x10   : > { %618 = vmatmul.mubr.msk.bf16.vlgmr.msra.gmra.mxu0 %vm316_vm1, %v644_v2  ;;  %v645_v13 = vld [vmem:[%s285_s11] sm:$0xff]   ;;  %s295_s20 = scalar_lea.vmem %s736_s5, %s608_s15 }
  0x11   : > { %629 = vmatprep.mubr.msk.bf16.mxu0 %vm655_vm0, %v654_v1 }
  0xd0   : > { %v354_v3 = vpop.f32.mrf.mxu0 }
  0xd2   : > { %v619_v4 = vpop.f32.mrf.mxu0 }
  0xd4   : > { %v357_v5 = vpop.f32.mrf.mxu0 }
  0xd5   : > { %v362_v6 = vpack.c.bf16 %v357_v5, %v354_v3 }
  0xd6   : > { %v620_v7 = vpop.f32.mrf.mxu0 }
  0xd7   : > { %622 = vmatpush3.bf16.msra.mxu1 %v362_v6 }
  0xda   : > { %624 = vmatmul.mubr.msk.bf16.vlgmr.msra.gmra.mxu1 %vm316_vm1, %v361_v8 }
 0x19a   : > { %v400_v9 = vpop.f32.mrf.mxu1 }
 0x19b   : > { %v408_v10 = vpack.c.bf16 %v400_v9, %v400_v9  ;;  %471 = vst.msk [vmem:[%s299_s14] sm:$0xff] %vm470_vm2, %v400_v9 }
 0x19c   : > { %v625_v11 = vpop.f32.mrf.mxu1 }
 0x19d   : > { %v427_v12 = vsel %vm425_vm3, %v408_v10, 0 }
 0x19e   : > { %v403_v14 = vpop.f32.mrf.mxu1  ;;  %628 = vmatpush3.bf16.msra.mxu0 %v427_v12 }
 0x1a0   : > { %v626_v15 = vpop.f32.mrf.mxu1 }
 0x1a1   : > { %630 = vmatmul.mubr.msk.bf16.vlgmr.msra.gmra.mxu0 %vm421_vm4, %v645_v13 }
 0x261   : > { %v463_v17 = vpop.f32.mrf.mxu0 }
 0x262   : > { %v464_v18 = vadd.f32 %v601_v16, %v463_v17 }
 0x263   : > { %v631_v19 = vpop.f32.mrf.mxu0 }
 0x264   : > { %472 = vst.msk [vmem:[%s295_s20] sm:$0xff] %vm470_vm2, %v464_v18 }
 0x265   : > { %v466_v20 = vpop.f32.mrf.mxu0 }
 0x266   : > { %v467_v21 = vadd.f32 %v601_v16, %v466_v20 }
 0x267   : > { %v632_v22 = vpop.f32.mrf.mxu0 }
 0x268   : > { %473 = vst.msk [vmem:[%s295_s20 + $0x8] sm:$0xff] %vm470_vm2, %v467_v21 }
 0x269 PF: > { %s17_s21 = sadd.s32 1, %s652_s21  }
 0x26a   : > { %p14_p4 = scmp.ge.s32.totalorder %s17_s21, 10  }
 0x26c   :  { %16 = sbr.rel (!%p14_p4) target bundleno = 1 (0x1), region = 88 }

// kernel: tile.38
= control target key start
LH: loop header
LB: loop body
LE: loop exit
PB: predicated region body
PF: predicated region fallthrough
CT: control target
= control target key end

     0   :  { %s22_s0 = inlined_call_operand.vmem [shape: f32[32], index: 0, kind: input, shape index: {}]   ;;  %s23_s1 = inlined_call_operand.vmem [shape: f32[8,32], index: 1, kind: output, shape index: {}]  }
   0x1   :  { %v4_v0 = vld [vmem:[%s22_s0] ss:$0 sm:$0xff] }
   0x2   :  { %5 = vst [vmem:[%s23_s1] sm:$0xff] %v4_v0 }

// kernel: tile.39
= control target key start
LH: loop header
LB: loop body
LE: loop exit
PB: predicated region body
PF: predicated region fallthrough
CT: control target
= control target key end

     0   :  { %s7_s6 = smov 3  ;;  %s14_s9 = smov 3  ;;  %vm4_vm0 = vcmask 261120   ;;  %vm11_vm1 = vcmask 1048320   ;;  %vm18_vm2 = vcmask 785920   ;;  %vm25_vm3 = vcmask 523520   ;;  %s79_s0 = inlined_call_operand.vmem [shape: f32[8,32], index: 0, kind: input, shape index: {}]   ;;  %s80_s1 = inlined_call_operand.vmem [shape: f32[1,256], index: 1, kind: output, shape index: {}]  }
   0x1   :  { %v41_v0 = vld [vmem:[%s79_s0 + $0x3] ss:$4 sm:%s7_s6]   ;;  %s48_s10 = smov 96   ;;  %s21_s11 = smov 3  ;;  %v42_v1 = vld [vmem:[%s79_s0 + $0x2] ss:$4 sm:%s14_s9]  }
   0x2   :  { %9 = vrot.lane.b32.xlu0 %v41_v0, %s48_s10  ;;  %v43_v2 = vld [vmem:[%s79_s0 + $0x1] ss:$4 sm:%s21_s11]   ;;  %s2_s16 = smov 3  ;;  %s49_s17 = smov 32  }
   0x3   :  { %23 = vrot.lane.b32.xlu1 %v43_v2, %s49_s17  ;;  %v3_v3 = vld [vmem:[%s79_s0] ss:$4 sm:%s2_s16]   ;;  %s50_s0 = smov 64  }
   0x4   :  { %5 = vst.msk [vmem:[#allocation0] ss:$8 sm:$0x3] %vm4_vm0, %v3_v3  }
   0x6   :  { %16 = vrot.lane.b32.xlu0 %v42_v1, %s50_s0 }
  0x74   :  { %v10_v4 = vpop.permute.xlu0 %9  }
  0x75   :  { %12 = vst.msk [vmem:[#allocation0] ss:$8 sm:$0x3] %vm11_vm1, %v10_v4   ;;  %v24_v5 = vpop.permute.xlu1 %23  }
  0x78   :  { %v17_v6 = vpop.permute.xlu0 %16  }
  0x79   :  { %19 = vst.msk [vmem:[#allocation0] ss:$8 sm:$0x3] %vm18_vm2, %v17_v6  }
  0x7a   :  { %26 = vst.msk [vmem:[#allocation0] ss:$8 sm:$0x3] %vm25_vm3, %v24_v5  }
  0x81   :  { %v31_v7 = vld [vmem:[#allocation0] sm:$0x1]  ;;  %v36_v8 = vld [vmem:[#allocation0 + $0x8] sm:$0x1] }
  0x82   :  { %34 = vst [vmem:[%s80_s1] sm:$0x1] %v31_v7  ;;  %44 = vst [vmem:[%s80_s1 + $0x1] sm:$0x1] %v36_v8 }

// kernel: dthgnn_forward.9
= control target key start
LH: loop header
LB: loop body
LE: loop exit
PB: predicated region body
PF: predicated region fallthrough
CT: control target
= control target key end

     0   :  { %s1027_s18 = smov 0   ;;  %s1029_s19 = smov 0   ;;  %s1186_s0 = inlined_call_operand.vmem [shape: bf16[32,256], index: 0, kind: input, shape index: {}]   ;;  %s1187_s1 = inlined_call_operand.vmem [shape: bf16[256,256], index: 1, kind: input, shape index: {}]   ;;  %s1188_s2 = inlined_call_operand.vmem [shape: bf16[32,32], index: 2, kind: input, shape index: {}]   ;;  %s1189_s3 = inlined_call_operand.vmem [shape: bf16[32,256], index: 3, kind: input, shape index: {}]   ;;  %s1190_s4 = inlined_call_operand.vmem [shape: f32[1,256], index: 4, kind: input, shape index: {}]   ;;  %s1191_s5 = inlined_call_operand.vmem [shape: f32[32,256], index: 5, kind: output, shape index: {}]  }
   0x1   :  { %s1031_s20 = smov 0  }
   0x2 LB: > { %s27_s21 = sadd.s32 1, %s990_s19  ;;  %p836_p0 = scmp.ge.s32.totalorder %s994_s20, 1  ;;  %s994_s20 = sphi %s1031_s20, %s15_s20   ;;  %s990_s19 = sphi %s1029_s19, %s1193_s19   ;;  %s986_s18 = sphi %s1027_s18, %s1192_s18  }
   0x3   : > { %p29_p1 = scmp.ge.s32.totalorder %s27_s21, 2  ;;  %p246_p2 = scmp.lt.s32.totalorder %s994_s20, 3 }
   0x5   : > { %s1195_s21 = smov (%p29_p1, %s27_s21), 0  ;;  %p247_p3 = pnand %p836_p0, %p246_p2 }
   0x6   : > { %s837_s9 = sshll.u32 (!%p247_p3), %s986_s18, 1 }
   0x7   : > { %250 = sbr.rel (%p247_p3) target bundleno = 283 (0x11b), region = 40  ;;  %p300_p4 = scmp.lt.s32.totalorder (!%p247_p3), %s837_s9, 3 }
   0xc   : > { %v914_v0 = vld [vmem:[%s1187_s1 + $0x74] ss:$8 sps:$4 sm:$0xff]   ;;  %v916_v1 = vld [vmem:[%s1187_s1 + $0x70] ss:$8 sps:$4 sm:$0xff]   ;;  %v996_v2 = vmov 0   ;;  %s1197_s9 = smov (!%p300_p4, %s837_s9), 3  ;;  %v669_v40 = vlaneseq }
   0xd   : > { %443 = vmatprep.mubr.bf16.mxu0 %v996_v2  ;;  %624 = vmatprep.subr.bf16.mxu1 %v914_v0  ;;  %v917_v3 = vld [vmem:[%s1187_s1 + $0x64] ss:$8 sps:$4 sm:$0xff]   ;;  %v919_v4 = vld [vmem:[%s1187_s1 + $0x60] ss:$8 sps:$4 sm:$0xff]   ;;  %v920_v5 = vld [vmem:[%s1187_s1 + $0x54] ss:$8 sps:$4 sm:$0xff]  }
   0xe   : > { %625 = vmatpush1.bf16.msra.mxu1 %v916_v1  ;;  %v922_v6 = vld [vmem:[%s1187_s1 + $0x50] ss:$8 sps:$4 sm:$0xff]   ;;  %v923_v7 = vld [vmem:[%s1187_s1 + $0x44] ss:$8 sps:$4 sm:$0xff]   ;;  %v925_v8 = vld [vmem:[%s1187_s1 + $0x40] ss:$8 sps:$4 sm:$0xff]  }
   0xf   : > { %626 = vmatprep.subr.bf16.mxu1 %v917_v3  ;;  %v926_v9 = vld [vmem:[%s1187_s1 + $0x34] ss:$8 sps:$4 sm:$0xff]   ;;  %v928_v10 = vld [vmem:[%s1187_s1 + $0x30] ss:$8 sps:$4 sm:$0xff]   ;;  %v929_v11 = vld [vmem:[%s1187_s1 + $0x24] ss:$8 sps:$4 sm:$0xff]  }
  0x10   : > { %v953_v12 = vld [vmem:[%s1189_s3 + $0x14] ss:$8 sps:$4 sm:$0xff]   ;;  %v955_v13 = vld [vmem:[%s1189_s3 + $0x10] ss:$8 sps:$4 sm:$0xff]   ;;  %s841_s27 = sshll.u32 %s1197_s9, 2  ;;  %s887_s10 = sshll.u32 %s1197_s9, 3 }
  0x11   : > { %v931_v14 = vld [vmem:[%s1187_s1 + $0x20] ss:$8 sps:$4 sm:$0xff]   ;;  %v932_v15 = vld [vmem:[%s1187_s1 + $0x14] ss:$8 sps:$4 sm:$0xff]   ;;  %423 = vmatprep.subr.bf16.mxu0 %v953_v12  ;;  %v959_v16 = vld [vmem:[%s1189_s3 + $0x4] ss:$8 sps:$4 sm:$0xff]   ;;  %s316_s15 = scalar_lea.vmem %s1188_s2, %s841_s27  ;;  %s1112_s23 = scalar_lea.vmem %s1186_s0, %s887_s10 }
  0x12   : > { %627 = vmatpush1.bf16.msra.mxu1 %v919_v4  ;;  %424 = vmatpush1.bf16.msra.mxu0 %v955_v13  ;;  %v961_v17 = vld [vmem:[%s1189_s3] ss:$8 sps:$4 sm:$0xff]   ;;  %v934_v18 = vld [vmem:[%s1187_s1 + $0x10] ss:$8 sps:$4 sm:$0xff]   ;;  %v935_v19 = vld [vmem:[%s1187_s1 + $0x4] ss:$8 sps:$4 sm:$0xff]  }
  0x13   : > { %628 = vmatprep.subr.bf16.mxu1 %v920_v5  ;;  %425 = vmatprep.subr.bf16.mxu0 %v959_v16  ;;  %v965_v20 = vld [vmem:[%s316_s15] sm:$0xff]   ;;  %vm407_vm0 = vcmask 261120   ;;  %v938_v23 = vld [vmem:[%s1187_s1 + $0xf4] ss:$8 sps:$4 sm:$0xff]   ;;  %v940_v24 = vld [vmem:[%s1187_s1 + $0xf0] ss:$8 sps:$4 sm:$0xff]  }
  0x14   : > { %v971_v21 = vld [vmem:[%s1112_s23 + $0x4] ss:$8 sps:$4 sm:$0xff]   ;;  %v937_v22 = vld [vmem:[%s1187_s1] ss:$8 sps:$4 sm:$0xff]   ;;  %v944_v27 = vld [vmem:[%s1187_s1 + $0xd4] ss:$8 sps:$4 sm:$0xff]  }
  0x15   : > { %656 = vmatprep.mubr.bf16.mxu1 %v971_v21  ;;  %v941_v25 = vld [vmem:[%s1187_s1 + $0xe4] ss:$8 sps:$4 sm:$0xff]   ;;  %v943_v26 = vld [vmem:[%s1187_s1 + $0xe0] ss:$8 sps:$4 sm:$0xff]   ;;  %v946_v28 = vld [vmem:[%s1187_s1 + $0xd0] ss:$8 sps:$4 sm:$0xff]  }
  0x16   : > { %629 = vmatpush1.bf16.msra.mxu1 %v922_v6  ;;  %426 = vmatpush1.bf16.msra.mxu0 %v961_v17  ;;  %v947_v29 = vld [vmem:[%s1187_s1 + $0xc4] ss:$8 sps:$4 sm:$0xff]   ;;  %v949_v30 = vld [vmem:[%s1187_s1 + $0xc0] ss:$8 sps:$4 sm:$0xff]   ;;  %v950_v31 = vld [vmem:[%s1187_s1 + $0xb4] ss:$8 sps:$4 sm:$0xff]  }
  0x17   : > { %630 = vmatprep.subr.bf16.mxu1 %v923_v7  ;;  %v952_v32 = vld [vmem:[%s1187_s1 + $0xb0] ss:$8 sps:$4 sm:$0xff]   ;;  %v956_v33 = vld [vmem:[%s1187_s1 + $0xa4] ss:$8 sps:$4 sm:$0xff]   ;;  %v958_v34 = vld [vmem:[%s1187_s1 + $0xa0] ss:$8 sps:$4 sm:$0xff]  }
  0x18   : > { %v962_v35 = vld [vmem:[%s1187_s1 + $0x94] ss:$8 sps:$4 sm:$0xff]   ;;  %v964_v36 = vld [vmem:[%s1187_s1 + $0x90] ss:$8 sps:$4 sm:$0xff]   ;;  %v966_v37 = vld [vmem:[%s1187_s1 + $0x84] ss:$8 sps:$4 sm:$0xff]  }
  0x19   : > { %850 = vmatmul.mubr.msk.bf16.vlgmr.msra.gmra.mxu0 %vm407_vm0, %v965_v20  ;;  %v968_v38 = vld [vmem:[%s1187_s1 + $0x80] ss:$8 sps:$4 sm:$0xff]   ;;  %v670_v41 = vshrl.u32 %v669_v40, 7  ;;  %s888_s18 = sshll.u32 %s1197_s9, 4 }
  0x1a   : > { %631 = vmatpush1.bf16.msra.mxu1 %v925_v8  ;;  %v969_v39 = vld [vmem:[%s1112_s23] ss:$8 sps:$4 sm:$0xff]   ;;  %s338_s24 = scalar_lea.vmem %s1191_s5, %s888_s18 }
  0x1b   : > { %632 = vmatprep.subr.bf16.mxu1 %v926_v9  ;;  %v671_v43 = vsub.s32 0, %v670_v41  ;;  %v667_v44 = vld [vmem:[%s1190_s4] sm:$0x3]  ;;  %v675_v45 = vsub.s32 1, %v670_v41 }
  0x1d   : > { %v672_v47 = vrot.slane %v667_v44, %v671_v43  ;;  %v676_v50 = vrot.slane %v667_v44, %v675_v45 }
  0x1e   : > { %633 = vmatpush1.bf16.msra.mxu1 %v928_v10 }
  0x1f   : > { %634 = vmatprep.subr.bf16.mxu1 %v929_v11 }
  0x22   : > { %635 = vmatpush1.bf16.msra.mxu1 %v931_v14 }
  0x23   : > { %636 = vmatprep.subr.bf16.mxu1 %v932_v15 }
  0x26   : > { %637 = vmatpush1.bf16.msra.mxu1 %v934_v18 }
  0x27   : > { %638 = vmatprep.subr.bf16.mxu1 %v935_v19 }
  0x2a   : > { %639 = vmatpush1.bf16.msra.mxu1 %v937_v22 }
  0x2b   : > { %640 = vmatprep.subr.bf16.mxu1 %v938_v23 }
  0x2e   : > { %641 = vmatpush2.bf16.msra.mxu1 %v940_v24 }
  0x2f   : > { %642 = vmatprep.subr.bf16.mxu1 %v941_v25 }
  0x32   : > { %643 = vmatpush2.bf16.msra.mxu1 %v943_v26 }
  0x33   : > { %644 = vmatprep.subr.bf16.mxu1 %v944_v27 }
  0x36   : > { %645 = vmatpush2.bf16.msra.mxu1 %v946_v28 }
  0x37   : > { %646 = vmatprep.subr.bf16.mxu1 %v947_v29 }
  0x3a   : > { %647 = vmatpush2.bf16.msra.mxu1 %v949_v30 }
  0x3b   : > { %648 = vmatprep.subr.bf16.mxu1 %v950_v31 }
  0x3e   : > { %649 = vmatpush2.bf16.msra.mxu1 %v952_v32 }
  0x3f   : > { %650 = vmatprep.subr.bf16.mxu1 %v956_v33 }
  0x42   : > { %651 = vmatpush2.bf16.msra.mxu1 %v958_v34 }
  0x43   : > { %652 = vmatprep.subr.bf16.mxu1 %v962_v35 }
  0x46   : > { %653 = vmatpush2.bf16.msra.mxu1 %v964_v36 }
  0x47   : > { %654 = vmatprep.subr.bf16.mxu1 %v966_v37 }
  0x4a   : > { %655 = vmatpush2.bf16.msra.mxu1 %v968_v38 }
  0x4d   : > { %657 = vmatmul.mubr.bf16.vlgmr.msra.gmra.mxu1 %v969_v39 }
  0xd9   : > { %v445_v42 = vpop.f32.mrf.mxu0 }
  0xdb   : > { %v447_v46 = vpop.f32.mrf.mxu0 }
  0xdd   : > { %v449_v51 = vpop.f32.mrf.mxu0 }
  0xdf   : > { %v451_v59 = vpop.f32.mrf.mxu0 }
 0x10d   : > { %v658_v48 = vpop.f32.mrf.mxu1 }
 0x10e   : > { %v659_v49 = vadd.f32 %v658_v48, %v445_v42 }
 0x10f   : > { %v660_v52 = vpop.f32.mrf.mxu1 }
 0x110   : > { %v679_v53 = vadd.f32 %v672_v47, %v659_v49  ;;  %v661_v54 = vadd.f32 %v660_v52, %v447_v46 }
 0x111   : > { %v662_v55 = vpop.f32.mrf.mxu1 }
 0x112   : > { %v683_v56 = vmax.f32 %v679_v53, 0.0  ;;  %v680_v57 = vadd.f32 %v676_v50, %v661_v54  ;;  %v663_v58 = vadd.f32 %v662_v55, %v449_v51 }
 0x113   : > { %v664_v60 = vpop.f32.mrf.mxu1 }
 0x114   : > { %687 = vst [vmem:[%s338_s24] sm:$0xff] %v683_v56  ;;  %v684_v61 = vmax.f32 %v680_v57, 0.0  ;;  %v681_v62 = vadd.f32 %v672_v47, %v663_v58  ;;  %v665_v63 = vadd.f32 %v664_v60, %v451_v59 }
 0x116   : > { %688 = vst [vmem:[%s338_s24 + $0x8] sm:$0xff] %v684_v61  ;;  %v685_v0 = vmax.f32 %v681_v62, 0.0  ;;  %v682_v1 = vadd.f32 %v676_v50, %v665_v63 }
 0x118   : > { %689 = vst [vmem:[%s338_s24 + $0x10] sm:$0xff] %v685_v0  ;;  %v686_v2 = vmax.f32 %v682_v1, 0.0 }
 0x11a   : > { %690 = vst [vmem:[%s338_s24 + $0x18] sm:$0xff] %v686_v2 }
 0x11b PF: > { %s15_s20 = sadd.s32 1, %s994_s20   ;;  %s1192_s18 = smov %s990_s19 }
 0x11c   : > { %p12_p5 = scmp.ge.s32.totalorder %s15_s20, 4   ;;  %s1193_s19 = smov %s1195_s21 }
 0x11e   :  { %14 = sbr.rel (!%p12_p5) target bundleno = 2 (0x2), region = 82 }

// kernel: squeeze.24
= control target key start
LH: loop header
LB: loop body
LE: loop exit
PB: predicated region body
PF: predicated region fallthrough
CT: control target
= control target key end

     0   :  { %vm4_vm0 = vcmask 261120   ;;  %s116_s0 = inlined_call_operand.vmem [shape: f32[1,6,64], index: 0, kind: input, shape index: {}]   ;;  %s117_s1 = inlined_call_operand.hbm [shape: f32[6,2,32], index: 1, kind: output, shape index: {}]  }
   0x1   :  { %v7_v0 = vld [vmem:[%s116_s0] sm:$0x3f]  }
   0x2   :  { %v3_v1 = vld [vmem:[%s116_s0] sm:$0x3f]   ;;  %s95_s0 = smov 96  }
   0x3   :  { %8 = vrot.lane.b32.xlu0 %v7_v0, %s95_s0  ;;  %5 = vst.msk [vmem:[#allocation2] ss:$8 sm:$0xf] %vm4_vm0, %v3_v1   ;;  %6 = vst.msk [vmem:[#allocation2] ss:$8 sm:$0x30] %vm4_vm0, %v3_v1  }
   0x4   :  { %2 = vsyncpa [#allocation1], 0  ;;  %s96_s10 = smov [#allocation0]  }
   0x5   :  { %s61_s11 = sshll.u32 %s96_s10, 4  ;;  %s62_s11 = int_to_ptr.vmem [resolvable:$true] %s61_s11 }
   0x6   :  { %s73_s12 = scalar_lea.vmem %s62_s11, 192  ;;  %p78_p1 = scmp.lt.s32.totalorder %s62_s11, %s62_s11 }
   0x7   :  { %p74_p0 = scmp.ne.s32.totalorder %s62_s11, %s73_s12  ;;  %p79_p2 = scmp.lt.s32.totalorder %s73_s12, %s73_s12 }
   0x9   :  { %p80_p3 = por %p79_p2, %p78_p1 }
   0xb   :  { %p81_p4 = pnand %p80_p3, %p74_p0 }
  0x75   :  { %v9_v2 = vpop.permute.xlu0 %8  }
  0x76   :  { %12 = vst.msk [vmem:[#allocation2 + $0x1] ss:$8 sm:$0xf] %vm4_vm0, %v9_v2   ;;  %14 = vst.msk [vmem:[#allocation2 + $0x1] ss:$8 sm:$0x30] %vm4_vm0, %v9_v2  }
  0x7d   :  { %v44_v3 = vld [vmem:[#allocation2 + $0x20] sm:$0x3]  ;;  %v51_v4 = vld [vmem:[#allocation2 + $0x28] sm:$0x3]  ;;  %v30_v7 = vld [vmem:[#allocation2 + $0x10] sm:$0x3] }
  0x7e   :  { %v19_v5 = vld [vmem:[#allocation2] sm:$0x3]  ;;  %49 = vst [vmem:[#allocation0 + $0x8] sm:$0x3] %v44_v3  ;;  %56 = vst [vmem:[#allocation0 + $0xa] sm:$0x3] %v51_v4 }
  0x7f   :  { %22 = vst [vmem:[#allocation0] sm:$0x3] %v19_v5  ;;  %v24_v6 = vld [vmem:[#allocation2 + $0x8] sm:$0x3]  ;;  %v37_v8 = vld [vmem:[#allocation2 + $0x18] sm:$0x3] }
  0x80   :  { %28 = vst [vmem:[#allocation0 + $0x2] sm:$0x3] %v24_v6  ;;  %35 = vst [vmem:[#allocation0 + $0x4] sm:$0x3] %v30_v7 }
  0x81   :  { %42 = vst [vmem:[#allocation0 + $0x6] sm:$0x3] %v37_v8 }
  0x82   :  { %84 = shalt.err (!%p81_p4)
}
  0x83   :  { %64 = dma.vmem_to_hbm [thread:$0]  %s62_s11, 192, %s117_s1, [#allocation1]  }
  0x84   :  { %93 = dma.done.wait [#allocation1], 192  }
  0x85   :  { %94 = vsyncadd [#allocation1], 4294967104 }
  0x86   :  { %66 = vsyncpa [#allocation1], 1 }

// kernel: dthgnn_forward.10
= control target key start
LH: loop header
LB: loop body
LE: loop exit
PB: predicated region body
PF: predicated region fallthrough
CT: control target
= control target key end

     0   :  { %s515_s14 = smov 0   ;;  %s517_s15 = smov 0   ;;  %s554_s0 = inlined_call_operand.vmem [shape: bf16[32,24], index: 0, kind: input, shape index: {}]   ;;  %s555_s1 = inlined_call_operand.vmem [shape: bf16[24,1], index: 1, kind: input, shape index: {}]   ;;  %s556_s2 = inlined_call_operand.<no memory space> [shape: f32[1,1], index: 2, kind: input, shape index: {}]   ;;  %s557_s3 = inlined_call_operand.vmem [shape: f32[32,1], index: 3, kind: output, shape index: {}]  }
   0x1   :  { %v8_v0 = vstv %s556_s2  ;;  %s519_s16 = smov 0  }
   0x2   :  { %9 = vst [vmem:[#allocation2] sm:$0x1] %v8_v0 }
   0x3 LB: > { %s27_s2 = sadd.s32 1, %s484_s15  ;;  %p414_p0 = scmp.ge.s32.totalorder %s488_s16, 1  ;;  %s488_s16 = sphi %s519_s16, %s15_s16   ;;  %s484_s15 = sphi %s517_s15, %s559_s15   ;;  %s480_s14 = sphi %s515_s14, %s558_s14  }
   0x4   : > { %p29_p1 = scmp.ge.s32.totalorder %s27_s2, 2  ;;  %p171_p2 = scmp.lt.s32.totalorder %s488_s16, 3 }
   0x6   : > { %s561_s2 = smov (%p29_p1, %s27_s2), 0  ;;  %p172_p3 = pnand %p414_p0, %p171_p2 }
   0x7   : > { %s415_s19 = sshll.u32 (!%p172_p3), %s480_s14, 1 }
   0x8   : > { %175 = sbr.rel (%p172_p3) target bundleno = 222 (0xde), region = 32  ;;  %p206_p4 = scmp.lt.s32.totalorder (!%p172_p3), %s415_s19, 3 }
   0xd   : > { %v463_v1 = vld [vmem:[%s555_s1 + $0x8] ss:$0 sps:$4 sm:$0xff]   ;;  %vm258_vm0 = vcmask 1043456   ;;  %v490_v2 = vmov 0.0   ;;  %vm491_vm1 = vmmov 0   ;;  %v464_v4 = vld [vmem:[%s555_s1] sm:$0xff]  }
   0xe   : > { %429 = vmatprep.subr.bf16.mxu0 %v490_v2  ;;  %v260_v3 = vsel %vm258_vm0, %v463_v1, 0  ;;  %433 = vmatprep.mubr.msk.bf16.mxu0 %vm491_vm1, %v490_v2  ;;  %s563_s19 = smov (!%p206_p4, %s415_s19), 3  ;;  %vm254_vm2 = vcmask 195584   ;;  %v419_v6 = vld [vmem:[#allocation2] ss:$0 sm:$0xff]  ;;  %vm303_vm3 = vcmask 7168  }
   0xf   : > { %430 = vmatpush3.bf16.msra.mxu0 %v260_v3  ;;  %s416_s22 = sshll.u32 %s563_s19, 2  ;;  %s418_s26 = sshll.u32 %s563_s19, 3 }
  0x10   : > { %431 = vmatprep.subr.bf16.mxu0 %v490_v2  ;;  %s209_s25 = scalar_lea.vmem %s554_s0, %s416_s22  ;;  %s225_s29 = scalar_lea.vmem %s557_s3, %s418_s26 }
  0x11   : > { %v465_v5 = vld [vmem:[%s209_s25] sm:$0xff]  }
  0x13   : > { %432 = vmatpush3.bf16.msra.mxu0 %v464_v4 }
  0x16   : > { %434 = vmatmul.mubr.msk.bf16.vlgmr.msra.gmra.mxu0 %vm254_vm2, %v465_v5 }
  0xd6   : > { %v296_v7 = vpop.f32.mrf.mxu0 }
  0xd7   : > { %v297_v8 = vadd.f32 %v419_v6, %v296_v7 }
  0xd8   : > { %v435_v9 = vpop.f32.mrf.mxu0 }
  0xd9   : > { %304 = vst.msk [vmem:[%s225_s29] sm:$0xff] %vm303_vm3, %v297_v8 }
  0xda   : > { %v299_v10 = vpop.f32.mrf.mxu0 }
  0xdb   : > { %v300_v11 = vadd.f32 %v419_v6, %v299_v10 }
  0xdc   : > { %v436_v12 = vpop.f32.mrf.mxu0 }
  0xdd   : > { %305 = vst.msk [vmem:[%s225_s29 + $0x8] sm:$0xff] %vm303_vm3, %v300_v11 }
  0xde PF: > { %s15_s16 = sadd.s32 1, %s488_s16   ;;  %s558_s14 = smov %s484_s15 }
  0xdf   : > { %p12_p5 = scmp.ge.s32.totalorder %s15_s16, 4   ;;  %s559_s15 = smov %s561_s2 }
  0xe1   :  { %14 = sbr.rel (!%p12_p5) target bundleno = 3 (0x3), region = 68 }

// kernel: tile.43
= control target key start
LH: loop header
LB: loop body
LE: loop exit
PB: predicated region body
PF: predicated region fallthrough
CT: control target
= control target key end

     0   :  { %s22_s0 = inlined_call_operand.vmem [shape: f32[32], index: 0, kind: input, shape index: {}]   ;;  %s23_s1 = inlined_call_operand.vmem [shape: f32[5,32], index: 1, kind: output, shape index: {}]  }
   0x1   :  { %v4_v0 = vld [vmem:[%s22_s0] ss:$0 sm:$0xff] }
   0x2   :  { %5 = vst [vmem:[%s23_s1] sm:$0xff] %v4_v0 }

// kernel: tile.44
= control target key start
LH: loop header
LB: loop body
LE: loop exit
PB: predicated region body
PF: predicated region fallthrough
CT: control target
= control target key end

     0   :  { %s45_s8 = smov 96   ;;  %s2_s11 = smov 3  ;;  %vm4_vm0 = vcmask 261120   ;;  %vm10_vm1 = vcmask 1048320   ;;  %vm16_vm2 = vcmask 785920   ;;  %vm22_vm3 = vcmask 523520   ;;  %s76_s0 = inlined_call_operand.vmem [shape: f32[5,32], index: 0, kind: input, shape index: {}]   ;;  %s77_s1 = inlined_call_operand.vmem [shape: f32[1,160], index: 1, kind: output, shape index: {}]  }
   0x1   :  { %v38_v0 = vld [vmem:[%s76_s0 + $0x3] sm:$0x1]   ;;  %v40_v1 = vld [vmem:[%s76_s0 + $0x1] sm:$0x1]   ;;  %v39_v2 = vld [vmem:[%s76_s0 + $0x2] sm:$0x1]  }
   0x2   :  { %8 = vrot.lane.b32.xlu0 %v38_v0, %s45_s8  ;;  %s46_s14 = smov 32   ;;  %v3_v3 = vld [vmem:[%s76_s0] ss:$4 sm:%s2_s11]   ;;  %s47_s0 = smov 64  }
   0x3   :  { %20 = vrot.lane.b32.xlu1 %v40_v1, %s46_s14  ;;  %5 = vst.msk [vmem:[#allocation0] ss:$8 sm:$0x3] %vm4_vm0, %v3_v3  }
   0x6   :  { %14 = vrot.lane.b32.xlu0 %v39_v2, %s47_s0 }
   0xa   :  { %v33_v4 = vld [vmem:[#allocation0 + $0x8] sm:$0x1] }
   0xb   :  { %41 = vst [vmem:[%s77_s1 + $0x1] sm:$0x1] %v33_v4 }
  0x74   :  { %v9_v5 = vpop.permute.xlu0 %8  }
  0x75   :  { %11 = vst.msk [vmem:[#allocation0] sm:$0x1] %vm10_vm1, %v9_v5   ;;  %v21_v6 = vpop.permute.xlu1 %20  }
  0x78   :  { %v15_v7 = vpop.permute.xlu0 %14  }
  0x79   :  { %17 = vst.msk [vmem:[#allocation0] sm:$0x1] %vm16_vm2, %v15_v7  }
  0x7a   :  { %23 = vst.msk [vmem:[#allocation0] sm:$0x1] %vm22_vm3, %v21_v6  }
  0x81   :  { %v28_v8 = vld [vmem:[#allocation0] sm:$0x1] }
  0x82   :  { %31 = vst [vmem:[%s77_s1] sm:$0x1] %v28_v8 }

// kernel: dthgnn_forward.11
= control target key start
LH: loop header
LB: loop body
LE: loop exit
PB: predicated region body
PF: predicated region fallthrough
CT: control target
= control target key end

     0   :  { %s759_s12 = smov 0   ;;  %s761_s13 = smov 0   ;;  %s887_s0 = inlined_call_operand.vmem [shape: bf16[32,224], index: 0, kind: input, shape index: {}]   ;;  %s888_s1 = inlined_call_operand.vmem [shape: bf16[224,160], index: 1, kind: input, shape index: {}]   ;;  %s889_s2 = inlined_call_operand.vmem [shape: f32[1,160], index: 2, kind: input, shape index: {}]   ;;  %s890_s3 = inlined_call_operand.vmem [shape: f32[32,160], index: 3, kind: output, shape index: {}]  }
   0x1   :  { %s763_s14 = smov 0  }
   0x2 LB: > { %s25_s15 = sadd.s32 1, %s733_s13  ;;  %p604_p0 = scmp.ge.s32.totalorder %s737_s14, 1  ;;  %s737_s14 = sphi %s763_s14, %s13_s14   ;;  %s733_s13 = sphi %s761_s13, %s892_s13   ;;  %s729_s12 = sphi %s759_s12, %s891_s12  }
   0x3   : > { %p27_p1 = scmp.ge.s32.totalorder %s25_s15, 2  ;;  %p174_p2 = scmp.lt.s32.totalorder %s737_s14, 3 }
   0x5   : > { %s894_s15 = smov (%p27_p1, %s25_s15), 0  ;;  %p175_p3 = pnand %p604_p0, %p174_p2 }
   0x6   : > { %s605_s22 = sshll.u32 (!%p175_p3), %s729_s12, 1 }
   0x7   : > { %178 = sbr.rel (%p175_p3) target bundleno = 271 (0x10f), region = 32  ;;  %p214_p4 = scmp.lt.s32.totalorder (!%p175_p3), %s605_s22, 3 }
   0xc   : > { %v670_v0 = vld [vmem:[%s888_s1 + $0x74] ss:$8 sps:$4 sm:$0xff]   ;;  %v672_v1 = vld [vmem:[%s888_s1 + $0x70] ss:$8 sps:$4 sm:$0xff]   ;;  %v673_v2 = vld [vmem:[%s888_s1 + $0x64] ss:$8 sps:$4 sm:$0xff]   ;;  %v276_v30 = vlaneseq }
   0xd   : > { %439 = vmatprep.subr.bf16.mxu0 %v670_v0  ;;  %v675_v3 = vld [vmem:[%s888_s1 + $0x60] ss:$8 sps:$4 sm:$0xff]   ;;  %v676_v4 = vld [vmem:[%s888_s1 + $0x54] ss:$8 sps:$4 sm:$0xff]   ;;  %v678_v5 = vld [vmem:[%s888_s1 + $0x50] ss:$8 sps:$4 sm:$0xff]  }
   0xe   : > { %440 = vmatpush1.bf16.msra.mxu0 %v672_v1  ;;  %v679_v6 = vld [vmem:[%s888_s1 + $0x44] ss:$8 sps:$4 sm:$0xff]   ;;  %s896_s22 = smov (!%p214_p4, %s605_s22), 3  ;;  %v681_v7 = vld [vmem:[%s888_s1 + $0x40] ss:$8 sps:$4 sm:$0xff]   ;;  %vm435_vm0 = vcmask 785408  }
   0xf   : > { %441 = vmatprep.subr.bf16.mxu0 %v673_v2  ;;  %v682_v8 = vld [vmem:[%s888_s1 + $0x34] ss:$8 sps:$4 sm:$0xff]   ;;  %s644_s8 = sshll.u32 %s896_s22, 3  ;;  %v684_v9 = vld [vmem:[%s888_s1 + $0x30] ss:$8 sps:$4 sm:$0xff]   ;;  %v277_v31 = vshrl.u32 %v276_v30, 7 }
  0x10   : > { %v685_v10 = vld [vmem:[%s888_s1 + $0x24] ss:$8 sps:$4 sm:$0xff]   ;;  %s816_s18 = scalar_lea.vmem %s887_s0, %s644_s8  ;;  %v687_v11 = vld [vmem:[%s888_s1 + $0x20] ss:$8 sps:$4 sm:$0xff]   ;;  %v688_v13 = vld [vmem:[%s888_s1 + $0x14] ss:$8 sps:$4 sm:$0xff]  }
  0x11   : > { %v714_v12 = vld [vmem:[%s816_s18 + $0x4] ss:$8 sps:$4 sm:$0xff]   ;;  %v690_v14 = vld [vmem:[%s888_s1 + $0x10] ss:$8 sps:$4 sm:$0xff]   ;;  %v693_v16 = vld [vmem:[%s888_s1] ss:$8 sps:$4 sm:$0xff]  }
  0x12   : > { %442 = vmatpush1.bf16.msra.mxu0 %v675_v3  ;;  %641 = vmatprep.mubr.msk.bf16.mxu0 %vm435_vm0, %v714_v12  ;;  %v691_v15 = vld [vmem:[%s888_s1 + $0x4] ss:$8 sps:$4 sm:$0xff]   ;;  %v694_v17 = vld [vmem:[%s888_s1 + $0xd4] ss:$8 sps:$4 sm:$0xff]   ;;  %v696_v18 = vld [vmem:[%s888_s1 + $0xd0] ss:$8 sps:$4 sm:$0xff]  }
  0x13   : > { %443 = vmatprep.subr.bf16.mxu0 %v676_v4  ;;  %v697_v19 = vld [vmem:[%s888_s1 + $0xc4] ss:$8 sps:$4 sm:$0xff]   ;;  %v699_v20 = vld [vmem:[%s888_s1 + $0xc0] ss:$8 sps:$4 sm:$0xff]   ;;  %v700_v21 = vld [vmem:[%s888_s1 + $0xb4] ss:$8 sps:$4 sm:$0xff]  }
  0x14   : > { %v702_v22 = vld [vmem:[%s888_s1 + $0xb0] ss:$8 sps:$4 sm:$0xff]   ;;  %v703_v23 = vld [vmem:[%s888_s1 + $0xa4] ss:$8 sps:$4 sm:$0xff]   ;;  %v705_v24 = vld [vmem:[%s888_s1 + $0xa0] ss:$8 sps:$4 sm:$0xff]  }
  0x15   : > { %v706_v25 = vld [vmem:[%s888_s1 + $0x94] ss:$8 sps:$4 sm:$0xff]   ;;  %v708_v26 = vld [vmem:[%s888_s1 + $0x90] ss:$8 sps:$4 sm:$0xff]   ;;  %v709_v27 = vld [vmem:[%s888_s1 + $0x84] ss:$8 sps:$4 sm:$0xff]  }
  0x16   : > { %444 = vmatpush1.bf16.msra.mxu0 %v678_v5  ;;  %v711_v28 = vld [vmem:[%s888_s1 + $0x80] ss:$8 sps:$4 sm:$0xff]   ;;  %v278_v32 = vsub.s32 0, %v277_v31  ;;  %v282_v34 = vsub.s32 1, %v277_v31  ;;  %s645_s7 = sshll.u32 %s896_s22, 4  ;;  %vm483_vm1 = vcmask 261120  }
  0x17   : > { %445 = vmatprep.subr.bf16.mxu0 %v679_v6  ;;  %v712_v29 = vld [vmem:[%s816_s18] ss:$8 sps:$4 sm:$0xff]   ;;  %s240_s10 = scalar_lea.vmem %s890_s3, %s645_s7 }
  0x18   : > { %v274_v33 = vld [vmem:[%s889_s2] sm:$0x3] }
  0x19   : > { %v279_v35 = vrot.slane %v274_v33, %v278_v32  ;;  %v283_v36 = vrot.slane %v274_v33, %v282_v34 }
  0x1a   : > { %446 = vmatpush1.bf16.msra.mxu0 %v681_v7 }
  0x1b   : > { %447 = vmatprep.subr.bf16.mxu0 %v682_v8 }
  0x1e   : > { %448 = vmatpush1.bf16.msra.mxu0 %v684_v9 }
  0x1f   : > { %449 = vmatprep.subr.bf16.mxu0 %v685_v10 }
  0x22   : > { %450 = vmatpush1.bf16.msra.mxu0 %v687_v11 }
  0x23   : > { %451 = vmatprep.subr.bf16.mxu0 %v688_v13 }
  0x26   : > { %452 = vmatpush1.bf16.msra.mxu0 %v690_v14 }
  0x27   : > { %453 = vmatprep.subr.bf16.mxu0 %v691_v15 }
  0x2a   : > { %454 = vmatpush1.bf16.msra.mxu0 %v693_v16 }
  0x2b   : > { %459 = vmatprep.subr.bf16.mxu0 %v694_v17 }
  0x2e   : > { %460 = vmatpush2.bf16.msra.mxu0 %v696_v18 }
  0x2f   : > { %461 = vmatprep.subr.bf16.mxu0 %v697_v19 }
  0x32   : > { %462 = vmatpush2.bf16.msra.mxu0 %v699_v20 }
  0x33   : > { %463 = vmatprep.subr.bf16.mxu0 %v700_v21 }
  0x36   : > { %464 = vmatpush2.bf16.msra.mxu0 %v702_v22 }
  0x37   : > { %465 = vmatprep.subr.bf16.mxu0 %v703_v23 }
  0x3a   : > { %466 = vmatpush2.bf16.msra.mxu0 %v705_v24 }
  0x3b   : > { %467 = vmatprep.subr.bf16.mxu0 %v706_v25 }
  0x3e   : > { %468 = vmatpush2.bf16.msra.mxu0 %v708_v26 }
  0x3f   : > { %469 = vmatprep.subr.bf16.mxu0 %v709_v27 }
  0x42   : > { %470 = vmatpush2.bf16.msra.mxu0 %v711_v28 }
  0x45   : > { %472 = vmatmul.mubr.bf16.vlgmr.msra.gmra.mxu0 %v712_v29 }
 0x105   : > { %v473_v37 = vpop.f32.mrf.mxu0 }
 0x106   : > { %v474_v38 = vadd.f32 %v473_v37, %v279_v35 }
 0x107   : > { %v475_v39 = vpop.f32.mrf.mxu0 }
 0x108   : > { %482 = vst [vmem:[%s240_s10] sm:$0xff] %v474_v38  ;;  %v476_v40 = vadd.f32 %v475_v39, %v283_v36 }
 0x109   : > { %v477_v41 = vpop.f32.mrf.mxu0 }
 0x10a   : > { %484 = vst.msk [vmem:[%s240_s10 + $0x8] sm:$0xff] %vm483_vm1, %v476_v40  ;;  %v478_v42 = vadd.f32 %v477_v41, %v279_v35 }
 0x10b   : > { %v479_v43 = vpop.f32.mrf.mxu0 }
 0x10c   : > { %485 = vst [vmem:[%s240_s10 + $0x10] sm:$0xff] %v478_v42  ;;  %v480_v44 = vadd.f32 %v479_v43, %v283_v36 }
 0x10e   : > { %486 = vst.msk [vmem:[%s240_s10 + $0x18] sm:$0xff] %vm483_vm1, %v480_v44 }
 0x10f PF: > { %s13_s14 = sadd.s32 1, %s737_s14   ;;  %s891_s12 = smov %s733_s13 }
 0x110   : > { %p10_p5 = scmp.ge.s32.totalorder %s13_s14, 4   ;;  %s892_s13 = smov %s894_s15 }
 0x112   :  { %12 = sbr.rel (!%p10_p5) target bundleno = 2 (0x2), region = 68 }

// kernel: dthgnn_forward.12
= control target key start
LH: loop header
LB: loop body
LE: loop exit
PB: predicated region body
PF: predicated region fallthrough
CT: control target
= control target key end

     0   :  { %s737_s12 = smov 0   ;;  %s739_s13 = smov 0   ;;  %s861_s0 = inlined_call_operand.vmem [shape: bf16[16,224], index: 0, kind: input, shape index: {}]   ;;  %s862_s1 = inlined_call_operand.vmem [shape: bf16[224,160], index: 1, kind: input, shape index: {}]   ;;  %s863_s2 = inlined_call_operand.vmem [shape: f32[1,160], index: 2, kind: input, shape index: {}]   ;;  %s864_s3 = inlined_call_operand.vmem [shape: f32[16,160], index: 3, kind: output, shape index: {}]  }
   0x1   :  { %s741_s14 = smov 0  }
   0x2 LB: > { %s25_s15 = sadd.s32 1, %s711_s13  ;;  %p585_p0 = scmp.ge.s32.totalorder %s715_s14, 1  ;;  %s715_s14 = sphi %s741_s14, %s13_s14   ;;  %s711_s13 = sphi %s739_s13, %s866_s13   ;;  %s707_s12 = sphi %s737_s12, %s865_s12  }
   0x3   : > { %p27_p1 = scmp.ge.s32.totalorder %s25_s15, 2  ;;  %p172_p2 = scmp.lt.s32.totalorder %s715_s14, 3 }
   0x5   : > { %s868_s15 = smov (%p27_p1, %s25_s15), 0  ;;  %p173_p3 = pnand %p585_p0, %p172_p2 }
   0x6   : > { %p209_p4 = scmp.lt.s32.totalorder (!%p173_p3), %s707_s12, 1 }
   0x7   : > { %176 = sbr.rel (%p173_p3) target bundleno = 268 (0x10c), region = 32 }
   0xc   : > { %v649_v0 = vld [vmem:[%s862_s1 + $0x74] ss:$8 sps:$4 sm:$0xff]   ;;  %v651_v1 = vld [vmem:[%s862_s1 + $0x70] ss:$8 sps:$4 sm:$0xff]   ;;  %v652_v2 = vld [vmem:[%s862_s1 + $0x64] ss:$8 sps:$4 sm:$0xff]   ;;  %v267_v31 = vlaneseq }
   0xd   : > { %427 = vmatprep.subr.bf16.mxu0 %v649_v0  ;;  %v654_v3 = vld [vmem:[%s862_s1 + $0x60] ss:$8 sps:$4 sm:$0xff]   ;;  %v655_v4 = vld [vmem:[%s862_s1 + $0x54] ss:$8 sps:$4 sm:$0xff]   ;;  %v657_v5 = vld [vmem:[%s862_s1 + $0x50] ss:$8 sps:$4 sm:$0xff]  }
   0xe   : > { %428 = vmatpush1.bf16.msra.mxu0 %v651_v1  ;;  %v658_v6 = vld [vmem:[%s862_s1 + $0x44] ss:$8 sps:$4 sm:$0xff]   ;;  %s870_s12 = smov (!%p209_p4, %s707_s12), 1  ;;  %v660_v7 = vld [vmem:[%s862_s1 + $0x40] ss:$8 sps:$4 sm:$0xff]   ;;  %vm423_vm0 = vcmask 785408  }
   0xf   : > { %429 = vmatprep.subr.bf16.mxu0 %v652_v2  ;;  %v661_v8 = vld [vmem:[%s862_s1 + $0x34] ss:$8 sps:$4 sm:$0xff]   ;;  %s623_s7 = sshll.u32 %s870_s12, 3  ;;  %v663_v9 = vld [vmem:[%s862_s1 + $0x30] ss:$8 sps:$4 sm:$0xff]   ;;  %v268_v32 = vshrl.u32 %v267_v31, 7 }
  0x10   : > { %s213_s16 = scalar_lea.vmem %s861_s0, %s623_s7  ;;  %v664_v10 = vld [vmem:[%s862_s1 + $0x24] ss:$8 sps:$4 sm:$0xff]   ;;  %v666_v12 = vld [vmem:[%s862_s1 + $0x20] ss:$8 sps:$4 sm:$0xff]   ;;  %v667_v14 = vld [vmem:[%s862_s1 + $0x14] ss:$8 sps:$4 sm:$0xff]  }
  0x11   : > { %v236_v11 = vld [vmem:[%s213_s16] sm:$0xff]  ;;  %v669_v15 = vld [vmem:[%s862_s1 + $0x10] ss:$8 sps:$4 sm:$0xff]   ;;  %v673_v18 = vld [vmem:[%s862_s1 + $0xd4] ss:$8 sps:$4 sm:$0xff]   ;;  %v269_v33 = vsub.s32 0, %v268_v32 }
  0x12   : > { %430 = vmatpush1.bf16.msra.mxu0 %v654_v3  ;;  %v591_v13 = vcombine.high %v236_v11, %v236_v11  ;;  %v670_v16 = vld [vmem:[%s862_s1 + $0x4] ss:$8 sps:$4 sm:$0xff]   ;;  %v672_v17 = vld [vmem:[%s862_s1] ss:$8 sps:$4 sm:$0xff]   ;;  %v675_v19 = vld [vmem:[%s862_s1 + $0xd0] ss:$8 sps:$4 sm:$0xff]   ;;  %v590_v30 = vcombine.low %v236_v11, %v236_v11 }
  0x13   : > { %431 = vmatprep.subr.bf16.mxu0 %v655_v4  ;;  %v676_v20 = vld [vmem:[%s862_s1 + $0xc4] ss:$8 sps:$4 sm:$0xff]   ;;  %v678_v21 = vld [vmem:[%s862_s1 + $0xc0] ss:$8 sps:$4 sm:$0xff]   ;;  %v679_v22 = vld [vmem:[%s862_s1 + $0xb4] ss:$8 sps:$4 sm:$0xff]  }
  0x14   : > { %620 = vmatprep.mubr.msk.bf16.mxu0 %vm423_vm0, %v591_v13  ;;  %v681_v23 = vld [vmem:[%s862_s1 + $0xb0] ss:$8 sps:$4 sm:$0xff]   ;;  %v682_v24 = vld [vmem:[%s862_s1 + $0xa4] ss:$8 sps:$4 sm:$0xff]   ;;  %v684_v25 = vld [vmem:[%s862_s1 + $0xa0] ss:$8 sps:$4 sm:$0xff]  }
  0x15   : > { %v685_v26 = vld [vmem:[%s862_s1 + $0x94] ss:$8 sps:$4 sm:$0xff]   ;;  %v687_v27 = vld [vmem:[%s862_s1 + $0x90] ss:$8 sps:$4 sm:$0xff]   ;;  %v688_v28 = vld [vmem:[%s862_s1 + $0x84] ss:$8 sps:$4 sm:$0xff]  }
  0x16   : > { %432 = vmatpush1.bf16.msra.mxu0 %v657_v5  ;;  %v690_v29 = vld [vmem:[%s862_s1 + $0x80] ss:$8 sps:$4 sm:$0xff]   ;;  %v273_v35 = vsub.s32 1, %v268_v32  ;;  %s624_s5 = sshll.u32 %s870_s12, 4  ;;  %vm469_vm1 = vcmask 261120  }
  0x17   : > { %433 = vmatprep.subr.bf16.mxu0 %v658_v6  ;;  %v265_v34 = vld [vmem:[%s863_s2] sm:$0x3]  ;;  %s233_s8 = scalar_lea.vmem %s864_s3, %s624_s5 }
  0x18   : > { %v270_v36 = vrot.slane %v265_v34, %v269_v33  ;;  %v274_v37 = vrot.slane %v265_v34, %v273_v35 }
  0x1a   : > { %434 = vmatpush1.bf16.msra.mxu0 %v660_v7 }
  0x1b   : > { %435 = vmatprep.subr.bf16.mxu0 %v661_v8 }
  0x1e   : > { %436 = vmatpush1.bf16.msra.mxu0 %v663_v9 }
  0x1f   : > { %437 = vmatprep.subr.bf16.mxu0 %v664_v10 }
  0x22   : > { %438 = vmatpush1.bf16.msra.mxu0 %v666_v12 }
  0x23   : > { %439 = vmatprep.subr.bf16.mxu0 %v667_v14 }
  0x26   : > { %440 = vmatpush1.bf16.msra.mxu0 %v669_v15 }
  0x27   : > { %441 = vmatprep.subr.bf16.mxu0 %v670_v16 }
  0x2a   : > { %442 = vmatpush1.bf16.msra.mxu0 %v672_v17 }
  0x2b   : > { %447 = vmatprep.subr.bf16.mxu0 %v673_v18 }
  0x2e   : > { %448 = vmatpush2.bf16.msra.mxu0 %v675_v19 }
  0x2f   : > { %449 = vmatprep.subr.bf16.mxu0 %v676_v20 }
  0x32   : > { %450 = vmatpush2.bf16.msra.mxu0 %v678_v21 }
  0x33   : > { %451 = vmatprep.subr.bf16.mxu0 %v679_v22 }
  0x36   : > { %452 = vmatpush2.bf16.msra.mxu0 %v681_v23 }
  0x37   : > { %453 = vmatprep.subr.bf16.mxu0 %v682_v24 }
  0x3a   : > { %454 = vmatpush2.bf16.msra.mxu0 %v684_v25 }
  0x3b   : > { %455 = vmatprep.subr.bf16.mxu0 %v685_v26 }
  0x3e   : > { %456 = vmatpush2.bf16.msra.mxu0 %v687_v27 }
  0x3f   : > { %457 = vmatprep.subr.bf16.mxu0 %v688_v28 }
  0x42   : > { %458 = vmatpush2.bf16.msra.mxu0 %v690_v29 }
  0x45   : > { %460 = vmatmul.mubr.bf16.vlgmr.msra.gmra.mxu0 %v590_v30 }
 0x105   : > { %v461_v38 = vpop.f32.mrf.mxu0 }
 0x106   : > { %v462_v39 = vadd.f32 %v461_v38, %v270_v36 }
 0x107   : > { %v463_v40 = vpop.f32.mrf.mxu0 }
 0x108   : > { %468 = vst [vmem:[%s233_s8] sm:$0xff] %v462_v39  ;;  %v464_v41 = vadd.f32 %v463_v40, %v274_v37 }
 0x109   : > { %v465_v42 = vpop.f32.mrf.mxu0 }
 0x10a   : > { %470 = vst.msk [vmem:[%s233_s8 + $0x8] sm:$0xff] %vm469_vm1, %v464_v41 }
 0x10b   : > { %v466_v43 = vpop.f32.mrf.mxu0 }
 0x10c PF: > { %s13_s14 = sadd.s32 1, %s715_s14   ;;  %s865_s12 = smov %s711_s13 }
 0x10d   : > { %p10_p5 = scmp.ge.s32.totalorder %s13_s14, 4   ;;  %s866_s13 = smov %s868_s15 }
 0x10f   :  { %12 = sbr.rel (!%p10_p5) target bundleno = 2 (0x2), region = 68 }

// kernel: dthgnn_forward.13
= control target key start
LH: loop header
LB: loop body
LE: loop exit
PB: predicated region body
PF: predicated region fallthrough
CT: control target
= control target key end

     0   :  { %s644_s20 = smov 0   ;;  %s719_s0 = inlined_call_operand.vmem [shape: bf16[80,160], index: 0, kind: input, shape index: {}]   ;;  %s720_s1 = inlined_call_operand.vmem [shape: bf16[160,32], index: 1, kind: input, shape index: {}]   ;;  %s721_s2 = inlined_call_operand.vmem [shape: f32[1,32], index: 2, kind: input, shape index: {}]   ;;  %s722_s3 = inlined_call_operand.vmem [shape: f32[1,32], index: 3, kind: input, shape index: {}]   ;;  %s723_s4 = inlined_call_operand.<no memory space> [shape: f32[1,1], index: 4, kind: input, shape index: {}]   ;;  %s724_s5 = inlined_call_operand.vmem [shape: f32[80,1], index: 5, kind: output, shape index: {}]  }
   0x1   :  { %v10_v0 = vstv %s723_s4 }
   0x2   :  { %11 = vst [vmem:[#allocation2] sm:$0x1] %v10_v0 }
   0x3 LB: > { %s522_s21 = sadd.s32 4294967295, %s608_s20   ;;  %p526_p0 = scmp.ge.s32.totalorder %s608_s20, 1  ;;  %s608_s20 = sphi %s644_s20, %s17_s20  }
   0x4   : > { %p191_p1 = scmp.lt.s32.totalorder %s608_s20, 3 }
   0x6   : > { %p192_p2 = pnand %p526_p0, %p191_p1 }
   0x7   : > { %s220_s4 = smul.u32 (!%p192_p2), 5, %s522_s21 }
   0x8   : > { %195 = sbr.rel (%p192_p2) target bundleno = 403 (0x193), region = 40 }
   0x9   : > { %p221_p3 = scmp.lt.s32.totalorder (!%p192_p2), %s220_s4, 9 }
   0xd   : > { %v584_v1 = vld [vmem:[%s720_s1 + $0x38] sm:$0xff]   ;;  %v610_v2 = vmov 0   ;;  %v585_v3 = vld [vmem:[%s720_s1 + $0x30] sm:$0xff]   ;;  %s726_s4 = smov (!%p221_p3, %s220_s4), 9  ;;  %v586_v4 = vld [vmem:[%s720_s1 + $0x28] sm:$0xff]   ;;  %vm350_vm0 = vcmask 261120  }
   0xe   : > { %360 = vmatprep.subr.bf16.mxu0 %v610_v2  ;;  %555 = vmatprep.subr.bf16.mxu1 %v610_v2  ;;  %s554_s28 = sshll.u32 %s726_s4, 3  ;;  %v587_v5 = vld [vmem:[%s720_s1 + $0x20] sm:$0xff]   ;;  %v588_v8 = vld [vmem:[%s720_s1 + $0x18] sm:$0xff]   ;;  %v589_v9 = vld [vmem:[%s720_s1 + $0x10] sm:$0xff]   ;;  %vm460_vm1 = vcmask 7168  }
   0xf   : > { %361 = vmatpush1.bf16.msra.mxu0 %v584_v1  ;;  %565 = vmatpush1.bf16.msra.mxu1 %v584_v1  ;;  %s669_s6 = scalar_lea.vmem %s719_s0, %s554_s28  ;;  %v590_v10 = vld [vmem:[%s720_s1 + $0x8] sm:$0xff]   ;;  %v591_v11 = vld [vmem:[%s720_s1] sm:$0xff]   ;;  %s231_s29 = scalar_lea.vmem %s724_s5, %s554_s28 }
  0x10   : > { %362 = vmatprep.subr.bf16.mxu0 %v610_v2  ;;  %556 = vmatprep.subr.bf16.mxu1 %v610_v2  ;;  %v596_v6 = vld [vmem:[%s669_s6 + $0x4] ss:$8 sps:$4 sm:$0xff]   ;;  %v599_v7 = vld [vmem:[%s669_s6 + $0x14] ss:$8 sps:$4 sm:$0xff]   ;;  %v594_v15 = vld [vmem:[%s669_s6] ss:$8 sps:$4 sm:$0xff]  }
  0x11   : > { %547 = vmatprep.mubr.msk.bf16.mxu0 %vm350_vm0, %v596_v6  ;;  %548 = vmatprep.mubr.msk.bf16.mxu1 %vm350_vm0, %v599_v7  ;;  %v592_v12 = vld [vmem:[%s720_s1 + $0x48] sm:$0xff]   ;;  %v593_v13 = vld [vmem:[%s720_s1 + $0x40] sm:$0xff]   ;;  %v597_v16 = vld [vmem:[%s669_s6 + $0x10] ss:$8 sps:$4 sm:$0xff]  }
  0x12   : > { %v238_v14 = vld [vmem:[%s669_s6 + $0x20] sm:$0xff] }
  0x13   : > { %363 = vmatpush1.bf16.msra.mxu0 %v585_v3  ;;  %566 = vmatpush1.bf16.msra.mxu1 %v585_v3  ;;  %v536_v17 = vcombine.high %v238_v14, %v238_v14  ;;  %v535_v18 = vcombine.low %v238_v14, %v238_v14  ;;  %v530_v19 = vld [vmem:[%s721_s2] ss:$0 sm:$0xff] }
  0x14   : > { %364 = vmatprep.subr.bf16.mxu0 %v610_v2  ;;  %557 = vmatprep.subr.bf16.mxu1 %v610_v2  ;;  %v550_v26 = vld [vmem:[%s722_s3] ss:$0 sm:$0xff] }
  0x15   : > { %v551_v53 = vld [vmem:[#allocation2] ss:$0 sm:$0xff] }
  0x17   : > { %365 = vmatpush1.bf16.msra.mxu0 %v586_v4  ;;  %567 = vmatpush1.bf16.msra.mxu1 %v586_v4 }
  0x18   : > { %366 = vmatprep.subr.bf16.mxu0 %v610_v2  ;;  %558 = vmatprep.subr.bf16.mxu1 %v610_v2 }
  0x1b   : > { %367 = vmatpush1.bf16.msra.mxu0 %v587_v5  ;;  %568 = vmatpush1.bf16.msra.mxu1 %v587_v5 }
  0x1c   : > { %368 = vmatprep.subr.bf16.mxu0 %v610_v2  ;;  %559 = vmatprep.subr.bf16.mxu1 %v610_v2 }
  0x1f   : > { %369 = vmatpush1.bf16.msra.mxu0 %v588_v8  ;;  %569 = vmatpush1.bf16.msra.mxu1 %v588_v8 }
  0x20   : > { %370 = vmatprep.subr.bf16.mxu0 %v610_v2  ;;  %560 = vmatprep.subr.bf16.mxu1 %v610_v2 }
  0x23   : > { %371 = vmatpush1.bf16.msra.mxu0 %v589_v9  ;;  %570 = vmatpush1.bf16.msra.mxu1 %v589_v9 }
  0x24   : > { %372 = vmatprep.subr.bf16.mxu0 %v610_v2  ;;  %561 = vmatprep.subr.bf16.mxu1 %v610_v2 }
  0x27   : > { %373 = vmatpush1.bf16.msra.mxu0 %v590_v10  ;;  %571 = vmatpush1.bf16.msra.mxu1 %v590_v10 }
  0x28   : > { %374 = vmatprep.subr.bf16.mxu0 %v610_v2  ;;  %562 = vmatprep.subr.bf16.mxu1 %v610_v2 }
  0x2b   : > { %375 = vmatpush1.bf16.msra.mxu0 %v591_v11  ;;  %572 = vmatpush1.bf16.msra.mxu1 %v591_v11 }
  0x2c   : > { %388 = vmatprep.subr.bf16.mxu0 %v610_v2  ;;  %563 = vmatprep.subr.bf16.mxu1 %v610_v2 }
  0x2f   : > { %389 = vmatpush2.bf16.msra.mxu0 %v592_v12  ;;  %573 = vmatpush2.bf16.msra.mxu1 %v592_v12 }
  0x30   : > { %390 = vmatprep.subr.bf16.mxu0 %v610_v2  ;;  %564 = vmatprep.subr.bf16.mxu1 %v610_v2 }
  0x33   : > { %391 = vmatpush2.bf16.msra.mxu0 %v593_v13  ;;  %574 = vmatpush2.bf16.msra.mxu1 %v593_v13 }
  0x36   : > { %393 = vmatmul.mubr.bf16.vlgmr.msra.gmra.mxu0 %v594_v15  ;;  %401 = vmatmul.mubr.bf16.vlgmr.msra.gmra.mxu1 %v597_v16 }
  0x37   : > { %549 = vmatprep.mubr.msk.bf16.mxu1 %vm350_vm0, %v536_v17 }
  0x3e   : > { %409 = vmatmul.mubr.bf16.gmra.mxu1 %v535_v18 }
  0xf6   : > { %v394_v20 = vpop.f32.mrf.mxu0  ;;  %v402_v21 = vpop.f32.mrf.mxu1 }
  0xf7   : > { %v395_v22 = vadd.f32 %v530_v19, %v394_v20  ;;  %v403_v23 = vadd.f32 %v530_v19, %v402_v21 }
  0xf8   : > { %v396_v24 = vpop.f32.mrf.mxu0  ;;  %v404_v25 = vpop.f32.mrf.mxu1 }
  0xf9   : > { %v416_v27 = vmax.f32 %v395_v22, 0.0  ;;  %v418_v28 = vmax.f32 %v403_v23, 0.0 }
  0xfa   : > { %v397_v29 = vpop.f32.mrf.mxu0  ;;  %v405_v30 = vpop.f32.mrf.mxu1 }
  0xfb   : > { %v398_v31 = vadd.f32 %v530_v19, %v397_v29  ;;  %v406_v32 = vadd.f32 %v530_v19, %v405_v30  ;;  %v430_v33 = vmul.f32 %v550_v26, %v418_v28  ;;  %v428_v34 = vmul.f32 %v550_v26, %v416_v27 }
  0xfc   : > { %v399_v35 = vpop.f32.mrf.mxu0  ;;  %v407_v36 = vpop.f32.mrf.mxu1 }
  0xfd   : > { %v417_v37 = vmax.f32 %v398_v31, 0.0  ;;  %v419_v38 = vmax.f32 %v406_v32, 0.0  ;;  %v439_v39 = vsel %vm350_vm0, %v430_v33, 0.0  ;;  %v433_v40 = vsel %vm350_vm0, %v428_v34, 0.0 }
  0xfe   : > { %v410_v41 = vpop.f32.mrf.mxu1  ;;  %440 = vadd.xlane.f32.xlu1 %v439_v39  ;;  %434 = vadd.xlane.f32.xlu0 %v433_v40 }
  0xff   : > { %v411_v42 = vadd.f32 %v530_v19, %v410_v41  ;;  %v431_v43 = vmul.f32 %v550_v26, %v419_v38  ;;  %v429_v44 = vmul.f32 %v550_v26, %v417_v37 }
 0x100   : > { %v412_v45 = vpop.f32.mrf.mxu1 }
 0x101   : > { %v420_v46 = vmax.f32 %v411_v42, 0.0  ;;  %v442_v47 = vsel %vm350_vm0, %v431_v43, 0.0  ;;  %v436_v48 = vsel %vm350_vm0, %v429_v44, 0.0 }
 0x102   : > { %v413_v49 = vpop.f32.mrf.mxu1  ;;  %443 = vadd.xlane.f32.xlu1 %v442_v47  ;;  %437 = vadd.xlane.f32.xlu0 %v436_v48 }
 0x103   : > { %v432_v50 = vmul.f32 %v550_v26, %v420_v46 }
 0x104   : > { %v414_v51 = vpop.f32.mrf.mxu1 }
 0x105   : > { %v445_v52 = vsel %vm350_vm0, %v432_v50, 0.0 }
 0x106   : > { %446 = vadd.xlane.f32.xlu0 %v445_v52 }
 0x187   : > { %v441_v54 = vpop.xlane.xlu1 %440  ;;  %v435_v55 = vpop.xlane.xlu0 %434 }
 0x188   : > { %v457_v56 = vadd.f32 %v551_v53, %v441_v54  ;;  %v455_v57 = vadd.f32 %v551_v53, %v435_v55 }
 0x18a   : > { %463 = vst.msk [vmem:[%s231_s29 + $0x10] sm:$0xff] %vm460_vm1, %v457_v56  ;;  %461 = vst.msk [vmem:[%s231_s29] sm:$0xff] %vm460_vm1, %v455_v57 }
 0x18b   : > { %v444_v58 = vpop.xlane.xlu1 %443  ;;  %v438_v59 = vpop.xlane.xlu0 %437 }
 0x18c   : > { %v458_v60 = vadd.f32 %v551_v53, %v444_v58  ;;  %v456_v61 = vadd.f32 %v551_v53, %v438_v59 }
 0x18e   : > { %464 = vst.msk [vmem:[%s231_s29 + $0x18] sm:$0xff] %vm460_vm1, %v458_v60  ;;  %462 = vst.msk [vmem:[%s231_s29 + $0x8] sm:$0xff] %vm460_vm1, %v456_v61 }
 0x18f   : > { %v447_v62 = vpop.xlane.xlu0 %446 }
 0x190   : > { %v459_v63 = vadd.f32 %v551_v53, %v447_v62 }
 0x192   : > { %465 = vst.msk [vmem:[%s231_s29 + $0x20] sm:$0xff] %vm460_vm1, %v459_v63 }
 0x193 PF: > { %s17_s20 = sadd.s32 1, %s608_s20  }
 0x194   : > { %p14_p4 = scmp.ge.s32.totalorder %s17_s20, 4  }
 0x196   :  { %16 = sbr.rel (!%p14_p4) target bundleno = 3 (0x3), region = 70 }

</bundles_post_ra>
